<compile_context>
chip_gen: v7x
topology: tpu7x:2x2x1
jax: 0.10.0
libtpu: 0.0.40
codegen_flags: <defaults>
</compile_context>

<pallas_src>
import numpy as np

import jax
import jax.numpy as jnp
from jax.experimental import pallas as pl
from jax.experimental.pallas import tpu as pltpu


# ---------------------------------------------------------------------------
# Synthetic stand-in for cfg.maskiou_net: [(out_ch, kernel, stride), ...]
# last out_ch == num_classes; input_channels = 1 (as in FastMaskIoUNet).
# ---------------------------------------------------------------------------
MASKIOU_NET_CFG = [(8, 3, 2), (16, 3, 2), (8, 1, 1)]
INPUT_CHANNELS = 1
_LANE = 128


def _round_up(x, m):
    return ((x + m - 1) // m) * m


def init_params(key):
    """PyTorch-layout conv params: list of (w (Cout,Cin,k,k), b (Cout,), stride)."""
    params = []
    cin = INPUT_CHANNELS
    for li, (cout, k, stride) in enumerate(MASKIOU_NET_CFG):
        kw_key, kb_key = jax.random.split(jax.random.fold_in(key, li))
        w = 0.1 * jax.random.normal(kw_key, (cout, cin, k, k), jnp.float32)
        b = 0.01 * jax.random.normal(kb_key, (cout,), jnp.float32)
        params.append((w, b, stride))
        cin = cout
    return params


# ---------------------------------------------------------------------------
# Host-side precompute: fold each conv into k per-row-tap weight matrices M_i
# acting on the lane-dense (W*Cin) activation layout (+ a broadcast bias row):
#   y[b, p, q*G + co] = bias[co] + sum_i ( x[b, s*p+i, :] @ M_i )[q*G + co]
# with G = Cout for inner layers, G = round_up(Cout,128) for the last layer
# (so the fused global max-pool reduces over 128-aligned lane groups).
# All lane dims are zero-padded to multiples of 128.
# ---------------------------------------------------------------------------
def _build_layer_operands(params, H0, W0, C0):
    ops = []
    H, W, Cin = H0, W0, C0
    n_layers = len(params)
    for li, (w, b, stride) in enumerate(params):
        w_np = np.asarray(w, np.float32)          # (Cout, Cin, k, k)
        b_np = np.asarray(b, np.float32)
        Cout, _, k, _ = w_np.shape
        Ho = (H - k) // stride + 1
        Wo = (W - k) // stride + 1
        Wcpad = _round_up(W * Cin, _LANE)
        is_last = (li == n_layers - 1)
        group = _round_up(Cout, _LANE) if is_last else Cout
        Npad = Wo * group if is_last else _round_up(Wo * Cout, _LANE)

        M = np.zeros((k, Wcpad, Npad), np.float32)
        bias = np.zeros((1, Npad), np.float32)
        for q in range(Wo):
            o0 = q * group
            bias[0, o0:o0 + Cout] = b_np
            for i in range(k):
                for j in range(k):
                    c0 = (stride * q + j) * Cin
                    M[i, c0:c0 + Cin, o0:o0 + Cout] = w_np[:, :, i, j].T

        ops.append(dict(
            M=jnp.asarray(M, jnp.bfloat16),       # bf16 MXU operand
            bias=jnp.asarray(bias, jnp.float32),  # f32 epilogue
            k=k, stride=stride, Ho=Ho, Wo=Wo, Cin=Cin, Cout=Cout,
            Wcpad=Wcpad, Npad=Npad, group=group, is_last=is_last))
        H, W, Cin = Ho, Wo, Cout
    return ops


# ---------------------------------------------------------------------------
# Fused Pallas kernel: all conv layers + ReLU + global max-pool for one batch
# block of B samples.  Samples live on the sublane axis; every matmul is a
# 2-D (B, Kpad) @ (Kpad, Npad) MXU op with bf16 operands / f32 accumulation.
# ---------------------------------------------------------------------------
def _make_kernel(meta, H0):
    n_layers = len(meta)

    def kernel(*refs):
        x_ref = refs[0]
        o_ref = refs[-1]
        lrefs = refs[1:-1]

        # Layer-0 input rows straight from the (H0, B, W0pad) bf16 input block.
        rows = [x_ref[p] for p in range(H0)]              # each (B, W0pad) bf16

        for li, lm in enumerate(meta):
            m_ref, b_ref = lrefs[2 * li], lrefs[2 * li + 1]
            k, s, Ho = lm["k"], lm["stride"], lm["Ho"]
            Ms = [m_ref[i] for i in range(k)]             # hoist weight loads
            B = rows[0].shape[0]
            bias = jnp.broadcast_to(b_ref[...], (B, lm["Npad"]))  # hoisted broadcast
            last = (li == n_layers - 1)
            new_rows = []
            for p in range(Ho):
                acc = jnp.dot(rows[s * p], Ms[0],
                              preferred_element_type=jnp.float32)
                for i in range(1, k):
                    acc = acc + jnp.dot(rows[s * p + i], Ms[i],
                                        preferred_element_type=jnp.float32)
                y = jnp.maximum(acc + bias, 0.0)          # conv + bias + ReLU (f32)
                new_rows.append(y if last else y.astype(jnp.bfloat16))
            rows = new_rows

        # Fused global max-pool: last-layer rows are (B, Wo*group) with
        # 128-aligned q-groups -> pure VPU maximum tree, single dense store.
        lm = meta[-1]
        m = rows[0]
        for p in range(1, lm["Ho"]):
            m = jnp.maximum(m, rows[p])
        G = lm["group"]
        res = m[:, 0:G]
        for q in range(1, lm["Wo"]):
            res = jnp.maximum(res, m[:, q * G:(q + 1) * G])
        o_ref[...] = res                                  # (B, group) f32

    return kernel


def fast_maskiou_net_forward(x_nchw, params, block_n=None):
    """Inference forward. x_nchw: (N, 1, H, W) float32 -> (N, num_classes)."""
    N, C0, H0, W0 = x_nchw.shape
    assert C0 == INPUT_CHANNELS
    num_classes = params[-1][0].shape[0]

    # Batch block per grid step: sublane-dense (multiple of 8), up to 128 to fill
    # the MXU M-dim.  For large N this also gives >=2 grid steps so both v7x
    # TensorCores get work via dimension_semantics=("parallel",).
    if block_n is None:
        block_n = min(128, _round_up(N, 8))
    Nblk = _round_up(N, block_n)
    num_blocks = Nblk // block_n

    ops = _build_layer_operands(params, H0, W0, C0)
    meta = [{kk: vv for kk, vv in op.items() if kk not in ("M", "bias")} for op in ops]
    G_last = meta[-1]["group"]

    # Input: NCHW -> lane-dense (H, Nblk, W*C0) bf16, lanes padded to 128,
    # batch zero-padded to a multiple of block_n (stripped after the call).
    W0pad = _round_up(W0 * C0, _LANE)
    x_lane = jnp.transpose(x_nchw, (0, 2, 3, 1)).reshape(N, H0, W0 * C0)
    x_lane = x_lane.astype(jnp.float32)
    x_pad = jnp.zeros((Nblk, H0, W0pad), jnp.float32).at[:N, :, :W0 * C0].set(x_lane)
    x_t = jnp.transpose(x_pad, (1, 0, 2)).astype(jnp.bfloat16)   # (H0, Nblk, W0pad)

    flat_inputs = [x_t]
    in_specs = [pl.BlockSpec((H0, block_n, W0pad), lambda n: (0, n, 0))]
    for op in ops:
        flat_inputs += [op["M"], op["bias"]]
        # Constant index_map -> fetched once, VMEM-resident across the whole grid.
        # TODO(synk): pl.Buffered(1) pipeline_mode would halve constant VMEM on v7x.
        in_specs += [pl.BlockSpec(op["M"].shape, lambda n: (0, 0, 0)),
                     pl.BlockSpec(op["bias"].shape, lambda n: (0, 0))]

    # Advisory cost estimate (true conv flops; bytes = input + constants + output).
    flops = 0
    const_bytes = 0
    for op in ops:
        flops += 2 * Nblk * op["Ho"] * op["Wo"] * op["Cout"] * op["k"] * op["k"] * op["Cin"]
        const_bytes += int(op["M"].size) * 2 + int(op["bias"].size) * 4
    bytes_accessed = H0 * Nblk * W0pad * 2 + const_bytes + Nblk * G_last * 4

    out = pl.pallas_call(
        _make_kernel(meta, H0),
        grid=(num_blocks,),
        in_specs=in_specs,
        out_specs=pl.BlockSpec((block_n, G_last), lambda n: (n, 0)),
        out_shape=jax.ShapeDtypeStruct((Nblk, G_last), jnp.float32),
        compiler_params=pltpu.CompilerParams(
            dimension_semantics=("parallel",),       # megacore split on v7x
            vmem_limit_bytes=48 * 1024 * 1024,       # headroom within v7x 64 MiB/TC
        ),
        cost_estimate=pl.CostEstimate(
            flops=flops, transcendentals=0, bytes_accessed=bytes_accessed),
    )(*flat_inputs)
    return out[:N, :num_classes]


# ---------------------------------------------------------------------------
# Pure-JAX reference (XLA conv) for correctness checking.
# ---------------------------------------------------------------------------
def reference_forward(x_nchw, params):
    x = jnp.transpose(x_nchw, (0, 2, 3, 1)).astype(jnp.float32)   # NHWC
    for (w, b, stride) in params:
        w_hwio = jnp.transpose(w, (2, 3, 1, 0))
        y = jax.lax.conv_general_dilated(
            x, w_hwio, window_strides=(stride, stride), padding="VALID",
            dimension_numbers=("NHWC", "HWIO", "NHWC"),
            precision=jax.lax.Precision.HIGHEST)
        x = jnp.maximum(y + b, 0.0)
    return jnp.max(x, axis=(1, 2))


if __name__ == "__main__":
    key = jax.random.PRNGKey(0)
    params = init_params(key)

    # Small deterministic input consistent with the module (mask crops, 1 channel).
    x = jax.random.uniform(jax.random.fold_in(key, 123), (2, 1, 16, 16), jnp.float32)

    out = jax.block_until_ready(fast_maskiou_net_forward(x, params))
    assert out.shape == (2, MASKIOU_NET_CFG[-1][0]), out.shape
    assert bool(jnp.all(jnp.isfinite(out)))

    ref = jax.block_until_ready(reference_forward(x, params))
    # bf16 MXU operands with f32 accumulation -> slightly looser atol than pure f32.
    np.testing.assert_allclose(np.asarray(out), np.asarray(ref), rtol=2e-2, atol=5e-3)

    print("KERNEL_OK")
</pallas_src>

<mosaic_0001>
module attributes {stable_mosaic.version = 11 : i64} {
  func.func @kernel(%arg0: i32, %arg1: memref<16x8x128xbf16, #tpu.memory_space<vmem>>, %arg2: memref<3x128x128xbf16, #tpu.memory_space<vmem>>, %arg3: memref<1x128xf32, #tpu.memory_space<vmem>>, %arg4: memref<3x128x128xbf16, #tpu.memory_space<vmem>>, %arg5: memref<1x128xf32, #tpu.memory_space<vmem>>, %arg6: memref<1x128x384xbf16, #tpu.memory_space<vmem>>, %arg7: memref<1x384xf32, #tpu.memory_space<vmem>>, %arg8: memref<8x128xf32, #tpu.memory_space<vmem>>) attributes {dimension_semantics = [#tpu.dimension_semantics<parallel>], iteration_bounds = array<i64: 1>, scalar_prefetch = 0 : i64, scratch_operands = 0 : i64, tpu.core_type = #tpu.core_type<tc>, window_params = [{transform_indices = @transform_0, window_bounds = array<i64: 16, 8, 128>}, {pipeline_mode = #tpu.pipeline_mode<synchronous>, transform_indices = @transform_1, window_bounds = array<i64: 3, 128, 128>}, {pipeline_mode = #tpu.pipeline_mode<synchronous>, transform_indices = @transform_2, window_bounds = array<i64: 1, 128>}, {pipeline_mode = #tpu.pipeline_mode<synchronous>, transform_indices = @transform_3, window_bounds = array<i64: 3, 128, 128>}, {pipeline_mode = #tpu.pipeline_mode<synchronous>, transform_indices = @transform_4, window_bounds = array<i64: 1, 128>}, {pipeline_mode = #tpu.pipeline_mode<synchronous>, transform_indices = @transform_5, window_bounds = array<i64: 1, 128, 384>}, {pipeline_mode = #tpu.pipeline_mode<synchronous>, transform_indices = @transform_6, window_bounds = array<i64: 1, 384>}, {transform_indices = @transform_7, window_bounds = array<i64: 8, 128>}]} {
    %c0 = arith.constant 0 : index
    %c0_0 = arith.constant 0 : index
    %c0_1 = arith.constant 0 : index
    %0 = vector.load %arg1[%c0, %c0_0, %c0_1] : memref<16x8x128xbf16, #tpu.memory_space<vmem>>, vector<1x8x128xbf16>
    %1 = vector.shape_cast %0 : vector<1x8x128xbf16> to vector<8x128xbf16>
    %c1 = arith.constant 1 : index
    %c0_2 = arith.constant 0 : index
    %c0_3 = arith.constant 0 : index
    %2 = vector.load %arg1[%c1, %c0_2, %c0_3] : memref<16x8x128xbf16, #tpu.memory_space<vmem>>, vector<1x8x128xbf16>
    %3 = vector.shape_cast %2 : vector<1x8x128xbf16> to vector<8x128xbf16>
    %c2 = arith.constant 2 : index
    %c0_4 = arith.constant 0 : index
    %c0_5 = arith.constant 0 : index
    %4 = vector.load %arg1[%c2, %c0_4, %c0_5] : memref<16x8x128xbf16, #tpu.memory_space<vmem>>, vector<1x8x128xbf16>
    %5 = vector.shape_cast %4 : vector<1x8x128xbf16> to vector<8x128xbf16>
    %c3 = arith.constant 3 : index
    %c0_6 = arith.constant 0 : index
    %c0_7 = arith.constant 0 : index
    %6 = vector.load %arg1[%c3, %c0_6, %c0_7] : memref<16x8x128xbf16, #tpu.memory_space<vmem>>, vector<1x8x128xbf16>
    %7 = vector.shape_cast %6 : vector<1x8x128xbf16> to vector<8x128xbf16>
    %c4 = arith.constant 4 : index
    %c0_8 = arith.constant 0 : index
    %c0_9 = arith.constant 0 : index
    %8 = vector.load %arg1[%c4, %c0_8, %c0_9] : memref<16x8x128xbf16, #tpu.memory_space<vmem>>, vector<1x8x128xbf16>
    %9 = vector.shape_cast %8 : vector<1x8x128xbf16> to vector<8x128xbf16>
    %c5 = arith.constant 5 : index
    %c0_10 = arith.constant 0 : index
    %c0_11 = arith.constant 0 : index
    %10 = vector.load %arg1[%c5, %c0_10, %c0_11] : memref<16x8x128xbf16, #tpu.memory_space<vmem>>, vector<1x8x128xbf16>
    %11 = vector.shape_cast %10 : vector<1x8x128xbf16> to vector<8x128xbf16>
    %c6 = arith.constant 6 : index
    %c0_12 = arith.constant 0 : index
    %c0_13 = arith.constant 0 : index
    %12 = vector.load %arg1[%c6, %c0_12, %c0_13] : memref<16x8x128xbf16, #tpu.memory_space<vmem>>, vector<1x8x128xbf16>
    %13 = vector.shape_cast %12 : vector<1x8x128xbf16> to vector<8x128xbf16>
    %c7 = arith.constant 7 : index
    %c0_14 = arith.constant 0 : index
    %c0_15 = arith.constant 0 : index
    %14 = vector.load %arg1[%c7, %c0_14, %c0_15] : memref<16x8x128xbf16, #tpu.memory_space<vmem>>, vector<1x8x128xbf16>
    %15 = vector.shape_cast %14 : vector<1x8x128xbf16> to vector<8x128xbf16>
    %c8 = arith.constant 8 : index
    %c0_16 = arith.constant 0 : index
    %c0_17 = arith.constant 0 : index
    %16 = vector.load %arg1[%c8, %c0_16, %c0_17] : memref<16x8x128xbf16, #tpu.memory_space<vmem>>, vector<1x8x128xbf16>
    %17 = vector.shape_cast %16 : vector<1x8x128xbf16> to vector<8x128xbf16>
    %c9 = arith.constant 9 : index
    %c0_18 = arith.constant 0 : index
    %c0_19 = arith.constant 0 : index
    %18 = vector.load %arg1[%c9, %c0_18, %c0_19] : memref<16x8x128xbf16, #tpu.memory_space<vmem>>, vector<1x8x128xbf16>
    %19 = vector.shape_cast %18 : vector<1x8x128xbf16> to vector<8x128xbf16>
    %c10 = arith.constant 10 : index
    %c0_20 = arith.constant 0 : index
    %c0_21 = arith.constant 0 : index
    %20 = vector.load %arg1[%c10, %c0_20, %c0_21] : memref<16x8x128xbf16, #tpu.memory_space<vmem>>, vector<1x8x128xbf16>
    %21 = vector.shape_cast %20 : vector<1x8x128xbf16> to vector<8x128xbf16>
    %c11 = arith.constant 11 : index
    %c0_22 = arith.constant 0 : index
    %c0_23 = arith.constant 0 : index
    %22 = vector.load %arg1[%c11, %c0_22, %c0_23] : memref<16x8x128xbf16, #tpu.memory_space<vmem>>, vector<1x8x128xbf16>
    %23 = vector.shape_cast %22 : vector<1x8x128xbf16> to vector<8x128xbf16>
    %c12 = arith.constant 12 : index
    %c0_24 = arith.constant 0 : index
    %c0_25 = arith.constant 0 : index
    %24 = vector.load %arg1[%c12, %c0_24, %c0_25] : memref<16x8x128xbf16, #tpu.memory_space<vmem>>, vector<1x8x128xbf16>
    %25 = vector.shape_cast %24 : vector<1x8x128xbf16> to vector<8x128xbf16>
    %c13 = arith.constant 13 : index
    %c0_26 = arith.constant 0 : index
    %c0_27 = arith.constant 0 : index
    %26 = vector.load %arg1[%c13, %c0_26, %c0_27] : memref<16x8x128xbf16, #tpu.memory_space<vmem>>, vector<1x8x128xbf16>
    %27 = vector.shape_cast %26 : vector<1x8x128xbf16> to vector<8x128xbf16>
    %c14 = arith.constant 14 : index
    %c0_28 = arith.constant 0 : index
    %c0_29 = arith.constant 0 : index
    %28 = vector.load %arg1[%c14, %c0_28, %c0_29] : memref<16x8x128xbf16, #tpu.memory_space<vmem>>, vector<1x8x128xbf16>
    %29 = vector.shape_cast %28 : vector<1x8x128xbf16> to vector<8x128xbf16>
    %c0_30 = arith.constant 0 : index
    %c0_31 = arith.constant 0 : index
    %c0_32 = arith.constant 0 : index
    %30 = vector.load %arg2[%c0_30, %c0_31, %c0_32] : memref<3x128x128xbf16, #tpu.memory_space<vmem>>, vector<1x128x128xbf16>
    %31 = vector.shape_cast %30 : vector<1x128x128xbf16> to vector<128x128xbf16>
    %c1_33 = arith.constant 1 : index
    %c0_34 = arith.constant 0 : index
    %c0_35 = arith.constant 0 : index
    %32 = vector.load %arg2[%c1_33, %c0_34, %c0_35] : memref<3x128x128xbf16, #tpu.memory_space<vmem>>, vector<1x128x128xbf16>
    %33 = vector.shape_cast %32 : vector<1x128x128xbf16> to vector<128x128xbf16>
    %c2_36 = arith.constant 2 : index
    %c0_37 = arith.constant 0 : index
    %c0_38 = arith.constant 0 : index
    %34 = vector.load %arg2[%c2_36, %c0_37, %c0_38] : memref<3x128x128xbf16, #tpu.memory_space<vmem>>, vector<1x128x128xbf16>
    %35 = vector.shape_cast %34 : vector<1x128x128xbf16> to vector<128x128xbf16>
    %c0_39 = arith.constant 0 : index
    %c0_40 = arith.constant 0 : index
    %36 = vector.load %arg3[%c0_39, %c0_40] : memref<1x128xf32, #tpu.memory_space<vmem>>, vector<1x128xf32>
    %37 = vector.shape_cast %36 : vector<1x128xf32> to vector<1x128xf32>
    %38 = vector.broadcast %37 : vector<1x128xf32> to vector<8x128xf32>
    %cst = arith.constant dense<0.000000e+00> : vector<8x128xf32>
    %39 = tpu.matmul %1, %31, %cst {dimension_numbers = #tpu.dot_dimension_numbers<[1], [0], [0], [1], [0, 0, 1, 1], [], []>} : vector<8x128xbf16>, vector<128x128xbf16>, vector<8x128xf32> -> vector<8x128xf32>
    %cst_41 = arith.constant dense<0.000000e+00> : vector<8x128xf32>
    %40 = tpu.matmul %3, %33, %cst_41 {dimension_numbers = #tpu.dot_dimension_numbers<[1], [0], [0], [1], [0, 0, 1, 1], [], []>} : vector<8x128xbf16>, vector<128x128xbf16>, vector<8x128xf32> -> vector<8x128xf32>
    %41 = arith.addf %39, %40 : vector<8x128xf32>
    %cst_42 = arith.constant dense<0.000000e+00> : vector<8x128xf32>
    %42 = tpu.matmul %5, %35, %cst_42 {dimension_numbers = #tpu.dot_dimension_numbers<[1], [0], [0], [1], [0, 0, 1, 1], [], []>} : vector<8x128xbf16>, vector<128x128xbf16>, vector<8x128xf32> -> vector<8x128xf32>
    %43 = arith.addf %41, %42 : vector<8x128xf32>
    %44 = arith.addf %43, %38 : vector<8x128xf32>
    %cst_43 = arith.constant 0.000000e+00 : f32
    %45 = vector.broadcast %cst_43 : f32 to vector<8x128xf32>
    %46 = arith.maximumf %44, %45 : vector<8x128xf32>
    %47 = arith.truncf %46 : vector<8x128xf32> to vector<8x128xbf16>
    %cst_44 = arith.constant dense<0.000000e+00> : vector<8x128xf32>
    %48 = tpu.matmul %5, %31, %cst_44 {dimension_numbers = #tpu.dot_dimension_numbers<[1], [0], [0], [1], [0, 0, 1, 1], [], []>} : vector<8x128xbf16>, vector<128x128xbf16>, vector<8x128xf32> -> vector<8x128xf32>
    %cst_45 = arith.constant dense<0.000000e+00> : vector<8x128xf32>
    %49 = tpu.matmul %7, %33, %cst_45 {dimension_numbers = #tpu.dot_dimension_numbers<[1], [0], [0], [1], [0, 0, 1, 1], [], []>} : vector<8x128xbf16>, vector<128x128xbf16>, vector<8x128xf32> -> vector<8x128xf32>
    %50 = arith.addf %48, %49 : vector<8x128xf32>
    %cst_46 = arith.constant dense<0.000000e+00> : vector<8x128xf32>
    %51 = tpu.matmul %9, %35, %cst_46 {dimension_numbers = #tpu.dot_dimension_numbers<[1], [0], [0], [1], [0, 0, 1, 1], [], []>} : vector<8x128xbf16>, vector<128x128xbf16>, vector<8x128xf32> -> vector<8x128xf32>
    %52 = arith.addf %50, %51 : vector<8x128xf32>
    %53 = arith.addf %52, %38 : vector<8x128xf32>
    %cst_47 = arith.constant 0.000000e+00 : f32
    %54 = vector.broadcast %cst_47 : f32 to vector<8x128xf32>
    %55 = arith.maximumf %53, %54 : vector<8x128xf32>
    %56 = arith.truncf %55 : vector<8x128xf32> to vector<8x128xbf16>
    %cst_48 = arith.constant dense<0.000000e+00> : vector<8x128xf32>
    %57 = tpu.matmul %9, %31, %cst_48 {dimension_numbers = #tpu.dot_dimension_numbers<[1], [0], [0], [1], [0, 0, 1, 1], [], []>} : vector<8x128xbf16>, vector<128x128xbf16>, vector<8x128xf32> -> vector<8x128xf32>
    %cst_49 = arith.constant dense<0.000000e+00> : vector<8x128xf32>
    %58 = tpu.matmul %11, %33, %cst_49 {dimension_numbers = #tpu.dot_dimension_numbers<[1], [0], [0], [1], [0, 0, 1, 1], [], []>} : vector<8x128xbf16>, vector<128x128xbf16>, vector<8x128xf32> -> vector<8x128xf32>
    %59 = arith.addf %57, %58 : vector<8x128xf32>
    %cst_50 = arith.constant dense<0.000000e+00> : vector<8x128xf32>
    %60 = tpu.matmul %13, %35, %cst_50 {dimension_numbers = #tpu.dot_dimension_numbers<[1], [0], [0], [1], [0, 0, 1, 1], [], []>} : vector<8x128xbf16>, vector<128x128xbf16>, vector<8x128xf32> -> vector<8x128xf32>
    %61 = arith.addf %59, %60 : vector<8x128xf32>
    %62 = arith.addf %61, %38 : vector<8x128xf32>
    %cst_51 = arith.constant 0.000000e+00 : f32
    %63 = vector.broadcast %cst_51 : f32 to vector<8x128xf32>
    %64 = arith.maximumf %62, %63 : vector<8x128xf32>
    %65 = arith.truncf %64 : vector<8x128xf32> to vector<8x128xbf16>
    %cst_52 = arith.constant dense<0.000000e+00> : vector<8x128xf32>
    %66 = tpu.matmul %13, %31, %cst_52 {dimension_numbers = #tpu.dot_dimension_numbers<[1], [0], [0], [1], [0, 0, 1, 1], [], []>} : vector<8x128xbf16>, vector<128x128xbf16>, vector<8x128xf32> -> vector<8x128xf32>
    %cst_53 = arith.constant dense<0.000000e+00> : vector<8x128xf32>
    %67 = tpu.matmul %15, %33, %cst_53 {dimension_numbers = #tpu.dot_dimension_numbers<[1], [0], [0], [1], [0, 0, 1, 1], [], []>} : vector<8x128xbf16>, vector<128x128xbf16>, vector<8x128xf32> -> vector<8x128xf32>
    %68 = arith.addf %66, %67 : vector<8x128xf32>
    %cst_54 = arith.constant dense<0.000000e+00> : vector<8x128xf32>
    %69 = tpu.matmul %17, %35, %cst_54 {dimension_numbers = #tpu.dot_dimension_numbers<[1], [0], [0], [1], [0, 0, 1, 1], [], []>} : vector<8x128xbf16>, vector<128x128xbf16>, vector<8x128xf32> -> vector<8x128xf32>
    %70 = arith.addf %68, %69 : vector<8x128xf32>
    %71 = arith.addf %70, %38 : vector<8x128xf32>
    %cst_55 = arith.constant 0.000000e+00 : f32
    %72 = vector.broadcast %cst_55 : f32 to vector<8x128xf32>
    %73 = arith.maximumf %71, %72 : vector<8x128xf32>
    %74 = arith.truncf %73 : vector<8x128xf32> to vector<8x128xbf16>
    %cst_56 = arith.constant dense<0.000000e+00> : vector<8x128xf32>
    %75 = tpu.matmul %17, %31, %cst_56 {dimension_numbers = #tpu.dot_dimension_numbers<[1], [0], [0], [1], [0, 0, 1, 1], [], []>} : vector<8x128xbf16>, vector<128x128xbf16>, vector<8x128xf32> -> vector<8x128xf32>
    %cst_57 = arith.constant dense<0.000000e+00> : vector<8x128xf32>
    %76 = tpu.matmul %19, %33, %cst_57 {dimension_numbers = #tpu.dot_dimension_numbers<[1], [0], [0], [1], [0, 0, 1, 1], [], []>} : vector<8x128xbf16>, vector<128x128xbf16>, vector<8x128xf32> -> vector<8x128xf32>
    %77 = arith.addf %75, %76 : vector<8x128xf32>
    %cst_58 = arith.constant dense<0.000000e+00> : vector<8x128xf32>
    %78 = tpu.matmul %21, %35, %cst_58 {dimension_numbers = #tpu.dot_dimension_numbers<[1], [0], [0], [1], [0, 0, 1, 1], [], []>} : vector<8x128xbf16>, vector<128x128xbf16>, vector<8x128xf32> -> vector<8x128xf32>
    %79 = arith.addf %77, %78 : vector<8x128xf32>
    %80 = arith.addf %79, %38 : vector<8x128xf32>
    %cst_59 = arith.constant 0.000000e+00 : f32
    %81 = vector.broadcast %cst_59 : f32 to vector<8x128xf32>
    %82 = arith.maximumf %80, %81 : vector<8x128xf32>
    %83 = arith.truncf %82 : vector<8x128xf32> to vector<8x128xbf16>
    %cst_60 = arith.constant dense<0.000000e+00> : vector<8x128xf32>
    %84 = tpu.matmul %21, %31, %cst_60 {dimension_numbers = #tpu.dot_dimension_numbers<[1], [0], [0], [1], [0, 0, 1, 1], [], []>} : vector<8x128xbf16>, vector<128x128xbf16>, vector<8x128xf32> -> vector<8x128xf32>
    %cst_61 = arith.constant dense<0.000000e+00> : vector<8x128xf32>
    %85 = tpu.matmul %23, %33, %cst_61 {dimension_numbers = #tpu.dot_dimension_numbers<[1], [0], [0], [1], [0, 0, 1, 1], [], []>} : vector<8x128xbf16>, vector<128x128xbf16>, vector<8x128xf32> -> vector<8x128xf32>
    %86 = arith.addf %84, %85 : vector<8x128xf32>
    %cst_62 = arith.constant dense<0.000000e+00> : vector<8x128xf32>
    %87 = tpu.matmul %25, %35, %cst_62 {dimension_numbers = #tpu.dot_dimension_numbers<[1], [0], [0], [1], [0, 0, 1, 1], [], []>} : vector<8x128xbf16>, vector<128x128xbf16>, vector<8x128xf32> -> vector<8x128xf32>
    %88 = arith.addf %86, %87 : vector<8x128xf32>
    %89 = arith.addf %88, %38 : vector<8x128xf32>
    %cst_63 = arith.constant 0.000000e+00 : f32
    %90 = vector.broadcast %cst_63 : f32 to vector<8x128xf32>
    %91 = arith.maximumf %89, %90 : vector<8x128xf32>
    %92 = arith.truncf %91 : vector<8x128xf32> to vector<8x128xbf16>
    %cst_64 = arith.constant dense<0.000000e+00> : vector<8x128xf32>
    %93 = tpu.matmul %25, %31, %cst_64 {dimension_numbers = #tpu.dot_dimension_numbers<[1], [0], [0], [1], [0, 0, 1, 1], [], []>} : vector<8x128xbf16>, vector<128x128xbf16>, vector<8x128xf32> -> vector<8x128xf32>
    %cst_65 = arith.constant dense<0.000000e+00> : vector<8x128xf32>
    %94 = tpu.matmul %27, %33, %cst_65 {dimension_numbers = #tpu.dot_dimension_numbers<[1], [0], [0], [1], [0, 0, 1, 1], [], []>} : vector<8x128xbf16>, vector<128x128xbf16>, vector<8x128xf32> -> vector<8x128xf32>
    %95 = arith.addf %93, %94 : vector<8x128xf32>
    %cst_66 = arith.constant dense<0.000000e+00> : vector<8x128xf32>
    %96 = tpu.matmul %29, %35, %cst_66 {dimension_numbers = #tpu.dot_dimension_numbers<[1], [0], [0], [1], [0, 0, 1, 1], [], []>} : vector<8x128xbf16>, vector<128x128xbf16>, vector<8x128xf32> -> vector<8x128xf32>
    %97 = arith.addf %95, %96 : vector<8x128xf32>
    %98 = arith.addf %97, %38 : vector<8x128xf32>
    %cst_67 = arith.constant 0.000000e+00 : f32
    %99 = vector.broadcast %cst_67 : f32 to vector<8x128xf32>
    %100 = arith.maximumf %98, %99 : vector<8x128xf32>
    %101 = arith.truncf %100 : vector<8x128xf32> to vector<8x128xbf16>
    %c0_68 = arith.constant 0 : index
    %c0_69 = arith.constant 0 : index
    %c0_70 = arith.constant 0 : index
    %102 = vector.load %arg4[%c0_68, %c0_69, %c0_70] : memref<3x128x128xbf16, #tpu.memory_space<vmem>>, vector<1x128x128xbf16>
    %103 = vector.shape_cast %102 : vector<1x128x128xbf16> to vector<128x128xbf16>
    %c1_71 = arith.constant 1 : index
    %c0_72 = arith.constant 0 : index
    %c0_73 = arith.constant 0 : index
    %104 = vector.load %arg4[%c1_71, %c0_72, %c0_73] : memref<3x128x128xbf16, #tpu.memory_space<vmem>>, vector<1x128x128xbf16>
    %105 = vector.shape_cast %104 : vector<1x128x128xbf16> to vector<128x128xbf16>
    %c2_74 = arith.constant 2 : index
    %c0_75 = arith.constant 0 : index
    %c0_76 = arith.constant 0 : index
    %106 = vector.load %arg4[%c2_74, %c0_75, %c0_76] : memref<3x128x128xbf16, #tpu.memory_space<vmem>>, vector<1x128x128xbf16>
    %107 = vector.shape_cast %106 : vector<1x128x128xbf16> to vector<128x128xbf16>
    %c0_77 = arith.constant 0 : index
    %c0_78 = arith.constant 0 : index
    %108 = vector.load %arg5[%c0_77, %c0_78] : memref<1x128xf32, #tpu.memory_space<vmem>>, vector<1x128xf32>
    %109 = vector.shape_cast %108 : vector<1x128xf32> to vector<1x128xf32>
    %110 = vector.broadcast %109 : vector<1x128xf32> to vector<8x128xf32>
    %cst_79 = arith.constant dense<0.000000e+00> : vector<8x128xf32>
    %111 = tpu.matmul %47, %103, %cst_79 {dimension_numbers = #tpu.dot_dimension_numbers<[1], [0], [0], [1], [0, 0, 1, 1], [], []>} : vector<8x128xbf16>, vector<128x128xbf16>, vector<8x128xf32> -> vector<8x128xf32>
    %cst_80 = arith.constant dense<0.000000e+00> : vector<8x128xf32>
    %112 = tpu.matmul %56, %105, %cst_80 {dimension_numbers = #tpu.dot_dimension_numbers<[1], [0], [0], [1], [0, 0, 1, 1], [], []>} : vector<8x128xbf16>, vector<128x128xbf16>, vector<8x128xf32> -> vector<8x128xf32>
    %113 = arith.addf %111, %112 : vector<8x128xf32>
    %cst_81 = arith.constant dense<0.000000e+00> : vector<8x128xf32>
    %114 = tpu.matmul %65, %107, %cst_81 {dimension_numbers = #tpu.dot_dimension_numbers<[1], [0], [0], [1], [0, 0, 1, 1], [], []>} : vector<8x128xbf16>, vector<128x128xbf16>, vector<8x128xf32> -> vector<8x128xf32>
    %115 = arith.addf %113, %114 : vector<8x128xf32>
    %116 = arith.addf %115, %110 : vector<8x128xf32>
    %cst_82 = arith.constant 0.000000e+00 : f32
    %117 = vector.broadcast %cst_82 : f32 to vector<8x128xf32>
    %118 = arith.maximumf %116, %117 : vector<8x128xf32>
    %119 = arith.truncf %118 : vector<8x128xf32> to vector<8x128xbf16>
    %cst_83 = arith.constant dense<0.000000e+00> : vector<8x128xf32>
    %120 = tpu.matmul %65, %103, %cst_83 {dimension_numbers = #tpu.dot_dimension_numbers<[1], [0], [0], [1], [0, 0, 1, 1], [], []>} : vector<8x128xbf16>, vector<128x128xbf16>, vector<8x128xf32> -> vector<8x128xf32>
    %cst_84 = arith.constant dense<0.000000e+00> : vector<8x128xf32>
    %121 = tpu.matmul %74, %105, %cst_84 {dimension_numbers = #tpu.dot_dimension_numbers<[1], [0], [0], [1], [0, 0, 1, 1], [], []>} : vector<8x128xbf16>, vector<128x128xbf16>, vector<8x128xf32> -> vector<8x128xf32>
    %122 = arith.addf %120, %121 : vector<8x128xf32>
    %cst_85 = arith.constant dense<0.000000e+00> : vector<8x128xf32>
    %123 = tpu.matmul %83, %107, %cst_85 {dimension_numbers = #tpu.dot_dimension_numbers<[1], [0], [0], [1], [0, 0, 1, 1], [], []>} : vector<8x128xbf16>, vector<128x128xbf16>, vector<8x128xf32> -> vector<8x128xf32>
    %124 = arith.addf %122, %123 : vector<8x128xf32>
    %125 = arith.addf %124, %110 : vector<8x128xf32>
    %cst_86 = arith.constant 0.000000e+00 : f32
    %126 = vector.broadcast %cst_86 : f32 to vector<8x128xf32>
    %127 = arith.maximumf %125, %126 : vector<8x128xf32>
    %128 = arith.truncf %127 : vector<8x128xf32> to vector<8x128xbf16>
    %cst_87 = arith.constant dense<0.000000e+00> : vector<8x128xf32>
    %129 = tpu.matmul %83, %103, %cst_87 {dimension_numbers = #tpu.dot_dimension_numbers<[1], [0], [0], [1], [0, 0, 1, 1], [], []>} : vector<8x128xbf16>, vector<128x128xbf16>, vector<8x128xf32> -> vector<8x128xf32>
    %cst_88 = arith.constant dense<0.000000e+00> : vector<8x128xf32>
    %130 = tpu.matmul %92, %105, %cst_88 {dimension_numbers = #tpu.dot_dimension_numbers<[1], [0], [0], [1], [0, 0, 1, 1], [], []>} : vector<8x128xbf16>, vector<128x128xbf16>, vector<8x128xf32> -> vector<8x128xf32>
    %131 = arith.addf %129, %130 : vector<8x128xf32>
    %cst_89 = arith.constant dense<0.000000e+00> : vector<8x128xf32>
    %132 = tpu.matmul %101, %107, %cst_89 {dimension_numbers = #tpu.dot_dimension_numbers<[1], [0], [0], [1], [0, 0, 1, 1], [], []>} : vector<8x128xbf16>, vector<128x128xbf16>, vector<8x128xf32> -> vector<8x128xf32>
    %133 = arith.addf %131, %132 : vector<8x128xf32>
    %134 = arith.addf %133, %110 : vector<8x128xf32>
    %cst_90 = arith.constant 0.000000e+00 : f32
    %135 = vector.broadcast %cst_90 : f32 to vector<8x128xf32>
    %136 = arith.maximumf %134, %135 : vector<8x128xf32>
    %137 = arith.truncf %136 : vector<8x128xf32> to vector<8x128xbf16>
    %c0_91 = arith.constant 0 : index
    %c0_92 = arith.constant 0 : index
    %c0_93 = arith.constant 0 : index
    %138 = vector.load %arg6[%c0_91, %c0_92, %c0_93] : memref<1x128x384xbf16, #tpu.memory_space<vmem>>, vector<1x128x384xbf16>
    %139 = vector.shape_cast %138 : vector<1x128x384xbf16> to vector<128x384xbf16>
    %c0_94 = arith.constant 0 : index
    %c0_95 = arith.constant 0 : index
    %140 = vector.load %arg7[%c0_94, %c0_95] : memref<1x384xf32, #tpu.memory_space<vmem>>, vector<1x384xf32>
    %141 = vector.shape_cast %140 : vector<1x384xf32> to vector<1x384xf32>
    %142 = vector.broadcast %141 : vector<1x384xf32> to vector<8x384xf32>
    %cst_96 = arith.constant dense<0.000000e+00> : vector<8x384xf32>
    %143 = tpu.matmul %119, %139, %cst_96 {dimension_numbers = #tpu.dot_dimension_numbers<[1], [0], [0], [1], [0, 0, 1, 1], [], []>} : vector<8x128xbf16>, vector<128x384xbf16>, vector<8x384xf32> -> vector<8x384xf32>
    %144 = arith.addf %143, %142 : vector<8x384xf32>
    %cst_97 = arith.constant 0.000000e+00 : f32
    %145 = vector.broadcast %cst_97 : f32 to vector<8x384xf32>
    %146 = arith.maximumf %144, %145 : vector<8x384xf32>
    %cst_98 = arith.constant dense<0.000000e+00> : vector<8x384xf32>
    %147 = tpu.matmul %128, %139, %cst_98 {dimension_numbers = #tpu.dot_dimension_numbers<[1], [0], [0], [1], [0, 0, 1, 1], [], []>} : vector<8x128xbf16>, vector<128x384xbf16>, vector<8x384xf32> -> vector<8x384xf32>
    %148 = arith.addf %147, %142 : vector<8x384xf32>
    %cst_99 = arith.constant 0.000000e+00 : f32
    %149 = vector.broadcast %cst_99 : f32 to vector<8x384xf32>
    %150 = arith.maximumf %148, %149 : vector<8x384xf32>
    %cst_100 = arith.constant dense<0.000000e+00> : vector<8x384xf32>
    %151 = tpu.matmul %137, %139, %cst_100 {dimension_numbers = #tpu.dot_dimension_numbers<[1], [0], [0], [1], [0, 0, 1, 1], [], []>} : vector<8x128xbf16>, vector<128x384xbf16>, vector<8x384xf32> -> vector<8x384xf32>
    %152 = arith.addf %151, %142 : vector<8x384xf32>
    %cst_101 = arith.constant 0.000000e+00 : f32
    %153 = vector.broadcast %cst_101 : f32 to vector<8x384xf32>
    %154 = arith.maximumf %152, %153 : vector<8x384xf32>
    %155 = arith.maximumf %146, %150 : vector<8x384xf32>
    %156 = arith.maximumf %155, %154 : vector<8x384xf32>
    %157 = vector.extract_strided_slice %156 {offsets = [0, 0], sizes = [8, 128], strides = [1, 1]} : vector<8x384xf32> to vector<8x128xf32>
    %158 = vector.extract_strided_slice %156 {offsets = [0, 128], sizes = [8, 128], strides = [1, 1]} : vector<8x384xf32> to vector<8x128xf32>
    %159 = arith.maximumf %157, %158 : vector<8x128xf32>
    %160 = vector.extract_strided_slice %156 {offsets = [0, 256], sizes = [8, 128], strides = [1, 1]} : vector<8x384xf32> to vector<8x128xf32>
    %161 = arith.maximumf %159, %160 : vector<8x128xf32>
    %c0_102 = arith.constant 0 : index
    %c0_103 = arith.constant 0 : index
    %162 = vector.load %arg8[%c0_102, %c0_103] : memref<8x128xf32, #tpu.memory_space<vmem>>, vector<8x128xf32>
    tpu.vector_store %arg8[%c0_102, %c0_103], %161 {strides = array<i32>} : memref<8x128xf32, #tpu.memory_space<vmem>>, vector<8x128xf32>,
    return
  }
  func.func @transform_0(%arg0: i32) -> (i32, i32, i32) {
    %c0_i32 = arith.constant 0 : i32
    %c0_i32_0 = arith.constant 0 : i32
    %c0_i32_1 = arith.constant 0 : i32
    return %c0_i32, %arg0, %c0_i32_0 : i32, i32, i32
  }
  func.func @transform_1(%arg0: i32) -> (i32, i32, i32) {
    %c0_i32 = arith.constant 0 : i32
    %c0_i32_0 = arith.constant 0 : i32
    %c0_i32_1 = arith.constant 0 : i32
    %c0_i32_2 = arith.constant 0 : i32
    return %c0_i32, %c0_i32_0, %c0_i32_1 : i32, i32, i32
  }
  func.func @transform_2(%arg0: i32) -> (i32, i32) {
    %c0_i32 = arith.constant 0 : i32
    %c0_i32_0 = arith.constant 0 : i32
    %c0_i32_1 = arith.constant 0 : i32
    return %c0_i32, %c0_i32_0 : i32, i32
  }
  func.func @transform_3(%arg0: i32) -> (i32, i32, i32) {
    %c0_i32 = arith.constant 0 : i32
    %c0_i32_0 = arith.constant 0 : i32
    %c0_i32_1 = arith.constant 0 : i32
    %c0_i32_2 = arith.constant 0 : i32
    return %c0_i32, %c0_i32_0, %c0_i32_1 : i32, i32, i32
  }
  func.func @transform_4(%arg0: i32) -> (i32, i32) {
    %c0_i32 = arith.constant 0 : i32
    %c0_i32_0 = arith.constant 0 : i32
    %c0_i32_1 = arith.constant 0 : i32
    return %c0_i32, %c0_i32_0 : i32, i32
  }
  func.func @transform_5(%arg0: i32) -> (i32, i32, i32) {
    %c0_i32 = arith.constant 0 : i32
    %c0_i32_0 = arith.constant 0 : i32
    %c0_i32_1 = arith.constant 0 : i32
    %c0_i32_2 = arith.constant 0 : i32
    return %c0_i32, %c0_i32_0, %c0_i32_1 : i32, i32, i32
  }
  func.func @transform_6(%arg0: i32) -> (i32, i32) {
    %c0_i32 = arith.constant 0 : i32
    %c0_i32_0 = arith.constant 0 : i32
    %c0_i32_1 = arith.constant 0 : i32
    return %c0_i32, %c0_i32_0 : i32, i32
  }
  func.func @transform_7(%arg0: i32) -> (i32, i32) {
    %c0_i32 = arith.constant 0 : i32
    %c0_i32_0 = arith.constant 0 : i32
    return %arg0, %c0_i32 : i32, i32
  }
}

</mosaic_0001>

<bundles_post_ra>
// kernel: tpu_custom_call.1
= control target key start
LH: loop header
LB: loop body
LE: loop exit
PB: predicated region body
PF: predicated region fallthrough
CT: control target
= control target key end

     0   :  { %12 = vsyncpa [#allocation3], 0  ;;  %s4400_s0 = inlined_call_operand.hbm [shape: bf16[16,8,128], index: 0, kind: input, shape index: {}]   ;;  %s4401_s1 = inlined_call_operand.hbm [shape: bf16[3,128,128], index: 1, kind: input, shape index: {}]   ;;  %s4402_s2 = inlined_call_operand.vmem [shape: f32[1,128], index: 2, kind: input, shape index: {}]   ;;  %s4403_s3 = inlined_call_operand.hbm [shape: bf16[3,128,128], index: 3, kind: input, shape index: {}]   ;;  %s4404_s4 = inlined_call_operand.vmem [shape: f32[1,128], index: 4, kind: input, shape index: {}]   ;;  %s4405_s5 = inlined_call_operand.hbm [shape: bf16[1,128,384], index: 5, kind: input, shape index: {}]   ;;  %s4406_s6 = inlined_call_operand.vmem [shape: f32[1,384], index: 6, kind: input, shape index: {}]   ;;  %s4407_s7 = inlined_call_operand.hbm [shape: f32[8,128], index: 7, kind: output, shape index: {}]  }
   0x1   :  { %13 = vsyncpa [#allocation6], 0 }
   0x2   :  { %14 = vsyncpa [#allocation9], 0 }
   0x3   :  { %15 = vsyncpa [#allocation4], 0  ;;  %s3450_s24 = smov [#allocation5]   ;;  %s3451_s26 = smov [#allocation2]  }
   0x4   :  { %s33_s25 = sshll.u32 %s3450_s24, 4  ;;  %s21_s27 = sshll.u32 %s3451_s26, 4  ;;  %s34_s25 = int_to_ptr.vmem [resolvable:$true] %s33_s25  ;;  %s3502_s27 = int_to_ptr.vmem [resolvable:$true] %s21_s27 }
   0x5   :  { %s3332_s30 = scalar_lea.hbm %s4401_s1, 3072 }
   0x6   :  { %p3333_p0 = scmp.ne.s32.totalorder %s4401_s1, %s3332_s30  ;;  %p3336_p1 = scmp.lt.u32.totalorder %s3332_s30, %s4401_s1 }
   0x8   :  { %p3338_p2 = pnand %p3336_p1, %p3333_p0 }
   0xa   :  { %3341 = shalt.err (!%p3338_p2)
}
   0xb   :  { %s3342_s12 = scalar_lea.vmem %s34_s25, 3072  ;;  %p3347_p4 = scmp.lt.s32.totalorder %s34_s25, %s34_s25 }
   0xc   :  { %p3343_p3 = scmp.ne.s32.totalorder %s34_s25, %s3342_s12  ;;  %p3348_p5 = scmp.lt.s32.totalorder %s3342_s12, %s3342_s12 }
   0xe   :  { %p3349_p6 = por %p3348_p5, %p3347_p4 }
  0x10   :  { %p3350_p7 = pnand %p3349_p6, %p3343_p3 }
  0x12   :  { %3353 = shalt.err (!%p3350_p7)
}
  0x13   :  { %s3452_s13 = smov 64   ;;  %s3453_s14 = smov 4  }
  0x14   :  { %39 = dma.hbm_to_vmem [thread:$0]  %s4401_s1, 3072, %s34_s25, [#allocation6], %s3452_s13, %s3452_s13, %s3453_s14  }
  0x15   :  { %s3354_s19 = scalar_lea.hbm %s4400_s0, 1024 }
  0x16   :  { %p3355_p8 = scmp.ne.s32.totalorder %s4400_s0, %s3354_s19  ;;  %p3358_p9 = scmp.lt.u32.totalorder %s3354_s19, %s4400_s0 }
  0x18   :  { %p3360_p10 = pnand %p3358_p9, %p3355_p8 }
  0x1a   :  { %3363 = shalt.err (!%p3360_p10)
}
  0x1b   :  { %s3364_s24 = scalar_lea.vmem %s3502_s27, 1024  ;;  %p3369_p12 = scmp.lt.s32.totalorder %s3502_s27, %s3502_s27 }
  0x1c   :  { %p3365_p11 = scmp.ne.s32.totalorder %s3502_s27, %s3364_s24  ;;  %p3370_p13 = scmp.lt.s32.totalorder %s3364_s24, %s3364_s24 }
  0x1e   :  { %p3371_p0 = por %p3370_p13, %p3369_p12 }
  0x20   :  { %p3372_p1 = pnand %p3371_p0, %p3365_p11 }
  0x22   :  { %3375 = shalt.err (!%p3372_p1)
}
  0x23   :  { %27 = dma.hbm_to_vmem [thread:$0]  %s4400_s0, 1024, %s3502_s27, [#allocation3], %s3452_s13, %s3452_s13, %s3453_s14  }
  0x24   :  { %s3454_s26 = smov [#allocation7]   ;;  %s3455_s29 = smov [#allocation8]  }
  0x25   :  { %s47_s28 = sshll.u32 %s3454_s26, 4  ;;  %s61_s30 = sshll.u32 %s3455_s29, 4  ;;  %s48_s28 = int_to_ptr.vmem [resolvable:$true] %s47_s28  ;;  %s3539_s30 = int_to_ptr.vmem [resolvable:$true] %s61_s30 }
  0x26   :  { %s3376_s10 = scalar_lea.hbm %s4403_s3, 3072 }
  0x27   :  { %p3377_p2 = scmp.ne.s32.totalorder %s4403_s3, %s3376_s10  ;;  %p3380_p3 = scmp.lt.u32.totalorder %s3376_s10, %s4403_s3 }
  0x29   :  { %p3382_p4 = pnand %p3380_p3, %p3377_p2 }
  0x2b   :  { %3385 = shalt.err (!%p3382_p4)
}
  0x2c   :  { %s3386_s0 = scalar_lea.vmem %s48_s28, 3072  ;;  %p3391_p6 = scmp.lt.s32.totalorder %s48_s28, %s48_s28 }
  0x2d   :  { %p3387_p5 = scmp.ne.s32.totalorder %s48_s28, %s3386_s0  ;;  %p3392_p7 = scmp.lt.s32.totalorder %s3386_s0, %s3386_s0 }
  0x2f   :  { %p3393_p8 = por %p3392_p7, %p3391_p6 }
  0x31   :  { %p3394_p9 = pnand %p3393_p8, %p3387_p5 }
  0x33   :  { %3397 = shalt.err (!%p3394_p9)
}
  0x34   :  { %53 = dma.hbm_to_vmem [thread:$0]  %s4403_s3, 3072, %s48_s28, [#allocation6], %s3452_s13, %s3452_s13, %s3453_s14  }
  0x35   :  { %s3398_s20 = scalar_lea.hbm %s4405_s5, 3072 }
  0x36   :  { %p3399_p10 = scmp.ne.s32.totalorder %s4405_s5, %s3398_s20  ;;  %p3402_p11 = scmp.lt.u32.totalorder %s3398_s20, %s4405_s5 }
  0x38   :  { %p3404_p12 = pnand %p3402_p11, %p3399_p10 }
  0x3a   :  { %3407 = shalt.err (!%p3404_p12)
}
  0x3b   :  { %s3408_s1 = scalar_lea.vmem %s3539_s30, 3072  ;;  %p3413_p0 = scmp.lt.s32.totalorder %s3539_s30, %s3539_s30 }
  0x3c   :  { %p3409_p13 = scmp.ne.s32.totalorder %s3539_s30, %s3408_s1  ;;  %p3414_p1 = scmp.lt.s32.totalorder %s3408_s1, %s3408_s1 }
  0x3e   :  { %p3415_p2 = por %p3414_p1, %p3413_p0 }
  0x40   :  { %p3416_p3 = pnand %p3415_p2, %p3409_p13 }
  0x42   :  { %3419 = shalt.err (!%p3416_p3)
}
  0x43   :  { %s3456_s3 = smov 192   ;;  %s3457_s13 = smov 12  }
  0x44   :  { %67 = dma.hbm_to_vmem [thread:$0]  %s4405_s5, 3072, %s3539_s30, [#allocation9], %s3456_s3, %s3456_s3, %s3457_s13  }
  0x45   :  { %3442 = dma.done.wait [#allocation3], 1024  }
  0x46   :  { %3443 = vsyncadd [#allocation3], 4294966272 }
  0x47   :  { %3444 = dma.done.wait [#allocation6], 6144  }
  0x48   :  { %3445 = vsyncadd [#allocation6], 4294961152 }
  0x49   :  { %3446 = dma.done.wait [#allocation9], 3072  }
  0x4a   :  { %3447 = vsyncadd [#allocation9], 4294964224  ;;  %v3458_v0 = vmov 0.0   ;;  %vm3459_vm0 = vmmov 0   ;;  %v3579_v1 = vld [vmem:[#allocation5 + $0x40] sm:$0xff]   ;;  %v3584_v3 = vld [vmem:[#allocation5 + $0x48] sm:$0xff]  }
  0x4b   :  { %2580 = vmatprep.subr.bf16.mxu0 %v3458_v0  ;;  %2600 = vmatprep.subr.bf16.mxu1 %v3458_v0  ;;  %v3581_v2 = vld [vmem:[#allocation5] sm:$0xff]   ;;  %v3588_v4 = vld [vmem:[#allocation5 + $0x8] sm:$0xff]   ;;  %v3592_v5 = vld [vmem:[#allocation5 + $0x50] sm:$0xff]  }
  0x4c   :  { %2596 = vmatprep.mubr.msk.bf16.mxu0 %vm3459_vm0, %v3458_v0  ;;  %2616 = vmatprep.mubr.msk.bf16.mxu1 %vm3459_vm0, %v3458_v0  ;;  %v3596_v6 = vld [vmem:[#allocation5 + $0x10] sm:$0xff]   ;;  %v3600_v7 = vld [vmem:[#allocation5 + $0x58] sm:$0xff]   ;;  %v3608_v9 = vld [vmem:[#allocation5 + $0x60] sm:$0xff]  }
  0x4d   :  { %2581 = vmatpush3.bf16.msra.mxu0 %v3579_v1  ;;  %2601 = vmatpush3.bf16.msra.mxu1 %v3581_v2  ;;  %v3604_v8 = vld [vmem:[#allocation5 + $0x18] sm:$0xff]   ;;  %v3612_v10 = vld [vmem:[#allocation5 + $0x20] sm:$0xff]   ;;  %v3616_v11 = vld [vmem:[#allocation5 + $0x68] sm:$0xff]  }
  0x4e   :  { %2582 = vmatprep.subr.bf16.mxu0 %v3458_v0  ;;  %2602 = vmatprep.subr.bf16.mxu1 %v3458_v0  ;;  %v3620_v12 = vld [vmem:[#allocation5 + $0x28] sm:$0xff]   ;;  %v3624_v13 = vld [vmem:[#allocation5 + $0x70] sm:$0xff]   ;;  %v3631_v15 = vld [vmem:[#allocation5 + $0x78] sm:$0xff]  }
  0x4f   :  { %v3628_v14 = vld [vmem:[#allocation5 + $0x30] sm:$0xff]   ;;  %v3633_v16 = vld [vmem:[#allocation5 + $0x38] sm:$0xff]   ;;  %v85_v17 = vld [vmem:[#allocation2 + $0x4] sm:$0xf] }
  0x50   :  { %v3639_v18 = vld [vmem:[#allocation5 + $0x80] sm:$0xff]   ;;  %v3645_v20 = vld [vmem:[#allocation5 + $0x88] sm:$0xff]   ;;  %v3651_v21 = vld [vmem:[#allocation5 + $0x90] sm:$0xff]  }
  0x51   :  { %2583 = vmatpush3.bf16.msra.mxu0 %v3584_v3  ;;  %2603 = vmatpush3.bf16.msra.mxu1 %v3588_v4  ;;  %v83_v19 = vld [vmem:[#allocation2] sm:$0xf]  ;;  %v3661_v22 = vld [vmem:[#allocation5 + $0x98] sm:$0xff]   ;;  %v3673_v24 = vld [vmem:[#allocation5 + $0xa8] sm:$0xff]  }
  0x52   :  { %2584 = vmatprep.subr.bf16.mxu0 %v3458_v0  ;;  %2604 = vmatprep.subr.bf16.mxu1 %v3458_v0  ;;  %v3667_v23 = vld [vmem:[#allocation5 + $0xa0] sm:$0xff]   ;;  %v3680_v25 = vld [vmem:[#allocation5 + $0xb0] sm:$0xff]   ;;  %v3686_v26 = vld [vmem:[#allocation5 + $0xb8] sm:$0xff]  }
  0x53   :  { %v87_v27 = vld [vmem:[#allocation2 + $0x8] sm:$0xf]  ;;  %v89_v28 = vld [vmem:[#allocation2 + $0xc] sm:$0xf]  ;;  %v91_v29 = vld [vmem:[#allocation2 + $0x10] sm:$0xf] }
  0x54   :  { %v93_v30 = vld [vmem:[#allocation2 + $0x14] sm:$0xf]  ;;  %v95_v31 = vld [vmem:[#allocation2 + $0x18] sm:$0xf]  ;;  %v97_v32 = vld [vmem:[#allocation2 + $0x1c] sm:$0xf] }
  0x55   :  { %2585 = vmatpush3.bf16.msra.mxu0 %v3592_v5  ;;  %2605 = vmatpush3.bf16.msra.mxu1 %v3596_v6  ;;  %v99_v33 = vld [vmem:[#allocation2 + $0x20] sm:$0xf]  ;;  %v101_v34 = vld [vmem:[#allocation2 + $0x24] sm:$0xf]  ;;  %v103_v44 = vld [vmem:[#allocation2 + $0x28] sm:$0xf] }
  0x56   :  { %2586 = vmatprep.subr.bf16.mxu0 %v3458_v0  ;;  %2606 = vmatprep.subr.bf16.mxu1 %v3458_v0  ;;  %v105_v45 = vld [vmem:[#allocation2 + $0x2c] sm:$0xf]  ;;  %v107_v55 = vld [vmem:[#allocation2 + $0x30] sm:$0xf] }
  0x59   :  { %2587 = vmatpush3.bf16.msra.mxu0 %v3600_v7  ;;  %2607 = vmatpush3.bf16.msra.mxu1 %v3604_v8 }
  0x5a   :  { %2588 = vmatprep.subr.bf16.mxu0 %v3458_v0  ;;  %2608 = vmatprep.subr.bf16.mxu1 %v3458_v0 }
  0x5d   :  { %2589 = vmatpush3.bf16.msra.mxu0 %v3608_v9  ;;  %2609 = vmatpush3.bf16.msra.mxu1 %v3612_v10 }
  0x5e   :  { %2590 = vmatprep.subr.bf16.mxu0 %v3458_v0  ;;  %2610 = vmatprep.subr.bf16.mxu1 %v3458_v0 }
  0x61   :  { %2591 = vmatpush3.bf16.msra.mxu0 %v3616_v11  ;;  %2611 = vmatpush3.bf16.msra.mxu1 %v3620_v12 }
  0x62   :  { %2592 = vmatprep.subr.bf16.mxu0 %v3458_v0  ;;  %2612 = vmatprep.subr.bf16.mxu1 %v3458_v0 }
  0x65   :  { %2593 = vmatpush3.bf16.msra.mxu0 %v3624_v13  ;;  %2613 = vmatpush3.bf16.msra.mxu1 %v3628_v14 }
  0x66   :  { %2594 = vmatprep.subr.bf16.mxu0 %v3458_v0  ;;  %2614 = vmatprep.subr.bf16.mxu1 %v3458_v0 }
  0x69   :  { %2595 = vmatpush3.bf16.msra.mxu0 %v3631_v15  ;;  %2615 = vmatpush3.bf16.msra.mxu1 %v3633_v16 }
  0x6a   :  { %2620 = vmatprep.subr.bf16.mxu0 %v3458_v0  ;;  %2640 = vmatprep.subr.bf16.mxu1 %v3458_v0 }
  0x6c   :  { %2597 = vmatmul.mubr.bf16.vlgmr.msra.gmra.mrb[0].mxu0 %v85_v17  ;;  %2617 = vmatmul.mubr.bf16.vlgmr.msra.gmra.mrb[0].mxu1 %v83_v19 }
  0x6d   :  { %2621 = vmatpush3.bf16.msra.mxu0 %v3639_v18  ;;  %2641 = vmatpush3.bf16.msra.mxu1 %v3579_v1 }
  0x6e   :  { %2622 = vmatprep.subr.bf16.mxu0 %v3458_v0  ;;  %2642 = vmatprep.subr.bf16.mxu1 %v3458_v0 }
  0x6f   :  { %2636 = vmatprep.mubr.msk.bf16.mxu0 %vm3459_vm0, %v3458_v0  ;;  %2656 = vmatprep.mubr.msk.bf16.mxu1 %vm3459_vm0, %v3458_v0 }
  0x71   :  { %2623 = vmatpush3.bf16.msra.mxu0 %v3645_v20  ;;  %2643 = vmatpush3.bf16.msra.mxu1 %v3584_v3 }
  0x72   :  { %2624 = vmatprep.subr.bf16.mxu0 %v3458_v0  ;;  %2644 = vmatprep.subr.bf16.mxu1 %v3458_v0 }
  0x75   :  { %2625 = vmatpush3.bf16.msra.mxu0 %v3651_v21  ;;  %2645 = vmatpush3.bf16.msra.mxu1 %v3592_v5 }
  0x76   :  { %2626 = vmatprep.subr.bf16.mxu0 %v3458_v0  ;;  %2646 = vmatprep.subr.bf16.mxu1 %v3458_v0 }
  0x79   :  { %2627 = vmatpush3.bf16.msra.mxu0 %v3661_v22  ;;  %2647 = vmatpush3.bf16.msra.mxu1 %v3600_v7 }
  0x7a   :  { %2628 = vmatprep.subr.bf16.mxu0 %v3458_v0  ;;  %2648 = vmatprep.subr.bf16.mxu1 %v3458_v0 }
  0x7d   :  { %2629 = vmatpush3.bf16.msra.mxu0 %v3667_v23  ;;  %2649 = vmatpush3.bf16.msra.mxu1 %v3608_v9 }
  0x7e   :  { %2630 = vmatprep.subr.bf16.mxu0 %v3458_v0  ;;  %2650 = vmatprep.subr.bf16.mxu1 %v3458_v0 }
  0x81   :  { %2631 = vmatpush3.bf16.msra.mxu0 %v3673_v24  ;;  %2651 = vmatpush3.bf16.msra.mxu1 %v3616_v11 }
  0x82   :  { %2632 = vmatprep.subr.bf16.mxu0 %v3458_v0  ;;  %2652 = vmatprep.subr.bf16.mxu1 %v3458_v0 }
  0x85   :  { %2633 = vmatpush3.bf16.msra.mxu0 %v3680_v25  ;;  %2653 = vmatpush3.bf16.msra.mxu1 %v3624_v13 }
  0x86   :  { %2634 = vmatprep.subr.bf16.mxu0 %v3458_v0  ;;  %2654 = vmatprep.subr.bf16.mxu1 %v3458_v0 }
  0x89   :  { %2635 = vmatpush3.bf16.msra.mxu0 %v3686_v26  ;;  %2655 = vmatpush3.bf16.msra.mxu1 %v3631_v15 }
  0x8a   :  { %2660 = vmatprep.subr.bf16.mxu0 %v3458_v0  ;;  %2680 = vmatprep.subr.bf16.mxu1 %v3458_v0 }
  0x8c   :  { %2637 = vmatmul.mubr.bf16.vlgmr.msra.gmra.mrb[4].mxu0 %v87_v27  ;;  %2657 = vmatmul.mubr.bf16.vlgmr.msra.gmra.mrb[4].mxu1 %v89_v28  ;;  %v4044_v28 = vld [vmem:[#allocation7 + $0x80] sm:$0xff]  }
  0x8d   :  { %2661 = vmatpush3.bf16.msra.mxu0 %v3581_v2  ;;  %2681 = vmatpush3.bf16.msra.mxu1 %v3639_v18 }
  0x8e   :  { %2662 = vmatprep.subr.bf16.mxu0 %v3458_v0  ;;  %2682 = vmatprep.subr.bf16.mxu1 %v3458_v0 }
  0x8f   :  { %2676 = vmatprep.mubr.msk.bf16.mxu0 %vm3459_vm0, %v3458_v0  ;;  %2696 = vmatprep.mubr.msk.bf16.mxu1 %vm3459_vm0, %v3458_v0 }
  0x91   :  { %2663 = vmatpush3.bf16.msra.mxu0 %v3588_v4  ;;  %2683 = vmatpush3.bf16.msra.mxu1 %v3645_v20 }
  0x92   :  { %2664 = vmatprep.subr.bf16.mxu0 %v3458_v0  ;;  %2684 = vmatprep.subr.bf16.mxu1 %v3458_v0 }
  0x95   :  { %2665 = vmatpush3.bf16.msra.mxu0 %v3596_v6  ;;  %2685 = vmatpush3.bf16.msra.mxu1 %v3651_v21 }
  0x96   :  { %2666 = vmatprep.subr.bf16.mxu0 %v3458_v0  ;;  %2686 = vmatprep.subr.bf16.mxu1 %v3458_v0 }
  0x99   :  { %2667 = vmatpush3.bf16.msra.mxu0 %v3604_v8  ;;  %2687 = vmatpush3.bf16.msra.mxu1 %v3661_v22 }
  0x9a   :  { %2668 = vmatprep.subr.bf16.mxu0 %v3458_v0  ;;  %2688 = vmatprep.subr.bf16.mxu1 %v3458_v0 }
  0x9d   :  { %2669 = vmatpush3.bf16.msra.mxu0 %v3612_v10  ;;  %2689 = vmatpush3.bf16.msra.mxu1 %v3667_v23 }
  0x9e   :  { %2670 = vmatprep.subr.bf16.mxu0 %v3458_v0  ;;  %2690 = vmatprep.subr.bf16.mxu1 %v3458_v0 }
  0xa1   :  { %2671 = vmatpush3.bf16.msra.mxu0 %v3620_v12  ;;  %2691 = vmatpush3.bf16.msra.mxu1 %v3673_v24 }
  0xa2   :  { %2672 = vmatprep.subr.bf16.mxu0 %v3458_v0  ;;  %2692 = vmatprep.subr.bf16.mxu1 %v3458_v0 }
  0xa5   :  { %2673 = vmatpush3.bf16.msra.mxu0 %v3628_v14  ;;  %2693 = vmatpush3.bf16.msra.mxu1 %v3680_v25 }
  0xa6   :  { %2674 = vmatprep.subr.bf16.mxu0 %v3458_v0  ;;  %2694 = vmatprep.subr.bf16.mxu1 %v3458_v0 }
  0xa9   :  { %2675 = vmatpush3.bf16.msra.mxu0 %v3633_v16  ;;  %2695 = vmatpush3.bf16.msra.mxu1 %v3686_v26 }
  0xaa   :  { %2700 = vmatprep.subr.bf16.mxu0 %v3458_v0  ;;  %2720 = vmatprep.subr.bf16.mxu1 %v3458_v0 }
  0xac   :  { %2677 = vmatmul.mubr.bf16.vlgmr.msra.gmra.mrb[8].mxu0 %v87_v27  ;;  %2697 = vmatmul.mubr.bf16.vlgmr.msra.gmra.mrb[8].mxu1 %v91_v29  ;;  %v4040_v27 = vld [vmem:[#allocation7] sm:$0xff]  }
  0xad   :  { %2701 = vmatpush3.bf16.msra.mxu0 %v3579_v1  ;;  %2721 = vmatpush3.bf16.msra.mxu1 %v3581_v2 }
  0xae   :  { %2702 = vmatprep.subr.bf16.mxu0 %v3458_v0  ;;  %2722 = vmatprep.subr.bf16.mxu1 %v3458_v0 }
  0xaf   :  { %2716 = vmatprep.mubr.msk.bf16.mxu0 %vm3459_vm0, %v3458_v0  ;;  %2736 = vmatprep.mubr.msk.bf16.mxu1 %vm3459_vm0, %v3458_v0 }
  0xb1   :  { %2703 = vmatpush3.bf16.msra.mxu0 %v3584_v3  ;;  %2723 = vmatpush3.bf16.msra.mxu1 %v3588_v4 }
  0xb2   :  { %2704 = vmatprep.subr.bf16.mxu0 %v3458_v0  ;;  %2724 = vmatprep.subr.bf16.mxu1 %v3458_v0 }
  0xb5   :  { %2705 = vmatpush3.bf16.msra.mxu0 %v3592_v5  ;;  %2725 = vmatpush3.bf16.msra.mxu1 %v3596_v6 }
  0xb6   :  { %2706 = vmatprep.subr.bf16.mxu0 %v3458_v0  ;;  %2726 = vmatprep.subr.bf16.mxu1 %v3458_v0 }
  0xb9   :  { %2707 = vmatpush3.bf16.msra.mxu0 %v3600_v7  ;;  %2727 = vmatpush3.bf16.msra.mxu1 %v3604_v8 }
  0xba   :  { %2708 = vmatprep.subr.bf16.mxu0 %v3458_v0  ;;  %2728 = vmatprep.subr.bf16.mxu1 %v3458_v0 }
  0xbd   :  { %2709 = vmatpush3.bf16.msra.mxu0 %v3608_v9  ;;  %2729 = vmatpush3.bf16.msra.mxu1 %v3612_v10 }
  0xbe   :  { %2710 = vmatprep.subr.bf16.mxu0 %v3458_v0  ;;  %2730 = vmatprep.subr.bf16.mxu1 %v3458_v0 }
  0xc1   :  { %2711 = vmatpush3.bf16.msra.mxu0 %v3616_v11  ;;  %2731 = vmatpush3.bf16.msra.mxu1 %v3620_v12 }
  0xc2   :  { %2712 = vmatprep.subr.bf16.mxu0 %v3458_v0  ;;  %2732 = vmatprep.subr.bf16.mxu1 %v3458_v0 }
  0xc5   :  { %2713 = vmatpush3.bf16.msra.mxu0 %v3624_v13  ;;  %2733 = vmatpush3.bf16.msra.mxu1 %v3628_v14 }
  0xc6   :  { %2714 = vmatprep.subr.bf16.mxu0 %v3458_v0  ;;  %2734 = vmatprep.subr.bf16.mxu1 %v3458_v0 }
  0xc9   :  { %2715 = vmatpush3.bf16.msra.mxu0 %v3631_v15  ;;  %2735 = vmatpush3.bf16.msra.mxu1 %v3633_v16 }
  0xca   :  { %2740 = vmatprep.subr.bf16.mxu0 %v3458_v0  ;;  %2760 = vmatprep.subr.bf16.mxu1 %v3458_v0 }
  0xcc   :  { %2717 = vmatmul.mubr.bf16.vlgmr.msra.gmra.mrb[12].mxu0 %v93_v30  ;;  %2737 = vmatmul.mubr.bf16.vlgmr.msra.gmra.mrb[12].mxu1 %v91_v29  ;;  %v4048_v29 = vld [vmem:[#allocation7 + $0x8] sm:$0xff]   ;;  %v4060_v30 = vld [vmem:[#allocation7 + $0x10] sm:$0xff]  }
  0xcd   :  { %2741 = vmatpush3.bf16.msra.mxu0 %v3639_v18  ;;  %2761 = vmatpush3.bf16.msra.mxu1 %v3579_v1 }
  0xce   :  { %2742 = vmatprep.subr.bf16.mxu0 %v3458_v0  ;;  %2762 = vmatprep.subr.bf16.mxu1 %v3458_v0 }
  0xcf   :  { %2756 = vmatprep.mubr.msk.bf16.mxu0 %vm3459_vm0, %v3458_v0  ;;  %2776 = vmatprep.mubr.msk.bf16.mxu1 %vm3459_vm0, %v3458_v0 }
  0xd1   :  { %2743 = vmatpush3.bf16.msra.mxu0 %v3645_v20  ;;  %2763 = vmatpush3.bf16.msra.mxu1 %v3584_v3 }
  0xd2   :  { %2744 = vmatprep.subr.bf16.mxu0 %v3458_v0  ;;  %2764 = vmatprep.subr.bf16.mxu1 %v3458_v0 }
  0xd5   :  { %2745 = vmatpush3.bf16.msra.mxu0 %v3651_v21  ;;  %2765 = vmatpush3.bf16.msra.mxu1 %v3592_v5 }
  0xd6   :  { %2746 = vmatprep.subr.bf16.mxu0 %v3458_v0  ;;  %2766 = vmatprep.subr.bf16.mxu1 %v3458_v0 }
  0xd9   :  { %2747 = vmatpush3.bf16.msra.mxu0 %v3661_v22  ;;  %2767 = vmatpush3.bf16.msra.mxu1 %v3600_v7 }
  0xda   :  { %2748 = vmatprep.subr.bf16.mxu0 %v3458_v0  ;;  %2768 = vmatprep.subr.bf16.mxu1 %v3458_v0 }
  0xdd   :  { %2749 = vmatpush3.bf16.msra.mxu0 %v3667_v23  ;;  %2769 = vmatpush3.bf16.msra.mxu1 %v3608_v9 }
  0xde   :  { %2750 = vmatprep.subr.bf16.mxu0 %v3458_v0  ;;  %2770 = vmatprep.subr.bf16.mxu1 %v3458_v0 }
  0xe1   :  { %2751 = vmatpush3.bf16.msra.mxu0 %v3673_v24  ;;  %2771 = vmatpush3.bf16.msra.mxu1 %v3616_v11 }
  0xe2   :  { %2752 = vmatprep.subr.bf16.mxu0 %v3458_v0  ;;  %2772 = vmatprep.subr.bf16.mxu1 %v3458_v0 }
  0xe5   :  { %2753 = vmatpush3.bf16.msra.mxu0 %v3680_v25  ;;  %2773 = vmatpush3.bf16.msra.mxu1 %v3624_v13 }
  0xe6   :  { %2754 = vmatprep.subr.bf16.mxu0 %v3458_v0  ;;  %2774 = vmatprep.subr.bf16.mxu1 %v3458_v0 }
  0xe9   :  { %2755 = vmatpush3.bf16.msra.mxu0 %v3686_v26  ;;  %2775 = vmatpush3.bf16.msra.mxu1 %v3631_v15 }
  0xea   :  { %2780 = vmatprep.subr.bf16.mxu0 %v3458_v0  ;;  %2800 = vmatprep.subr.bf16.mxu1 %v3458_v0 }
  0xec   :  { %2757 = vmatmul.mubr.bf16.vlgmr.msra.gmra.mrb[16].mxu0 %v95_v31  ;;  %2777 = vmatmul.mubr.bf16.vlgmr.msra.gmra.mrb[16].mxu1 %v97_v32  ;;  %v4068_v32 = vld [vmem:[#allocation7 + $0x18] sm:$0xff]  }
  0xed   :  { %2781 = vmatpush3.bf16.msra.mxu0 %v3581_v2  ;;  %2801 = vmatpush3.bf16.msra.mxu1 %v3639_v18 }
  0xee   :  { %2782 = vmatprep.subr.bf16.mxu0 %v3458_v0  ;;  %2802 = vmatprep.subr.bf16.mxu1 %v3458_v0 }
  0xef   :  { %2796 = vmatprep.mubr.msk.bf16.mxu0 %vm3459_vm0, %v3458_v0  ;;  %2816 = vmatprep.mubr.msk.bf16.mxu1 %vm3459_vm0, %v3458_v0 }
  0xf1   :  { %2783 = vmatpush3.bf16.msra.mxu0 %v3588_v4  ;;  %2803 = vmatpush3.bf16.msra.mxu1 %v3645_v20 }
  0xf2   :  { %2784 = vmatprep.subr.bf16.mxu0 %v3458_v0  ;;  %2804 = vmatprep.subr.bf16.mxu1 %v3458_v0 }
  0xf5   :  { %2785 = vmatpush3.bf16.msra.mxu0 %v3596_v6  ;;  %2805 = vmatpush3.bf16.msra.mxu1 %v3651_v21 }
  0xf6   :  { %2786 = vmatprep.subr.bf16.mxu0 %v3458_v0  ;;  %2806 = vmatprep.subr.bf16.mxu1 %v3458_v0 }
  0xf9   :  { %2787 = vmatpush3.bf16.msra.mxu0 %v3604_v8  ;;  %2807 = vmatpush3.bf16.msra.mxu1 %v3661_v22 }
  0xfa   :  { %2788 = vmatprep.subr.bf16.mxu0 %v3458_v0  ;;  %2808 = vmatprep.subr.bf16.mxu1 %v3458_v0 }
  0xfd   :  { %2789 = vmatpush3.bf16.msra.mxu0 %v3612_v10  ;;  %2809 = vmatpush3.bf16.msra.mxu1 %v3667_v23 }
  0xfe   :  { %2790 = vmatprep.subr.bf16.mxu0 %v3458_v0  ;;  %2810 = vmatprep.subr.bf16.mxu1 %v3458_v0 }
 0x101   :  { %2791 = vmatpush3.bf16.msra.mxu0 %v3620_v12  ;;  %2811 = vmatpush3.bf16.msra.mxu1 %v3673_v24 }
 0x102   :  { %2792 = vmatprep.subr.bf16.mxu0 %v3458_v0  ;;  %2812 = vmatprep.subr.bf16.mxu1 %v3458_v0 }
 0x105   :  { %2793 = vmatpush3.bf16.msra.mxu0 %v3628_v14  ;;  %2813 = vmatpush3.bf16.msra.mxu1 %v3680_v25 }
 0x106   :  { %2794 = vmatprep.subr.bf16.mxu0 %v3458_v0  ;;  %2814 = vmatprep.subr.bf16.mxu1 %v3458_v0 }
 0x109   :  { %2795 = vmatpush3.bf16.msra.mxu0 %v3633_v16  ;;  %2815 = vmatpush3.bf16.msra.mxu1 %v3686_v26 }
 0x10a   :  { %2820 = vmatprep.subr.bf16.mxu0 %v3458_v0  ;;  %2840 = vmatprep.subr.bf16.mxu1 %v3458_v0 }
 0x10c   :  { %2797 = vmatmul.mubr.bf16.vlgmr.msra.gmra.mrb[20].mxu0 %v95_v31  ;;  %2817 = vmatmul.mubr.bf16.vlgmr.msra.gmra.mrb[20].mxu1 %v99_v33  ;;  %v4064_v31 = vld [vmem:[#allocation7 + $0x90] sm:$0xff]  }
 0x10d   :  { %2821 = vmatpush3.bf16.msra.mxu0 %v3579_v1  ;;  %2841 = vmatpush3.bf16.msra.mxu1 %v3581_v2 }
 0x10e   :  { %2822 = vmatprep.subr.bf16.mxu0 %v3458_v0  ;;  %2842 = vmatprep.subr.bf16.mxu1 %v3458_v0 }
 0x10f   :  { %2836 = vmatprep.mubr.msk.bf16.mxu0 %vm3459_vm0, %v3458_v0  ;;  %2856 = vmatprep.mubr.msk.bf16.mxu1 %vm3459_vm0, %v3458_v0 }
 0x111   :  { %2823 = vmatpush3.bf16.msra.mxu0 %v3584_v3  ;;  %2843 = vmatpush3.bf16.msra.mxu1 %v3588_v4 }
 0x112   :  { %2824 = vmatprep.subr.bf16.mxu0 %v3458_v0  ;;  %2844 = vmatprep.subr.bf16.mxu1 %v3458_v0 }
 0x115   :  { %2825 = vmatpush3.bf16.msra.mxu0 %v3592_v5  ;;  %2845 = vmatpush3.bf16.msra.mxu1 %v3596_v6 }
 0x116   :  { %2826 = vmatprep.subr.bf16.mxu0 %v3458_v0  ;;  %2846 = vmatprep.subr.bf16.mxu1 %v3458_v0 }
 0x119   :  { %2827 = vmatpush3.bf16.msra.mxu0 %v3600_v7  ;;  %2847 = vmatpush3.bf16.msra.mxu1 %v3604_v8 }
 0x11a   :  { %2828 = vmatprep.subr.bf16.mxu0 %v3458_v0  ;;  %2848 = vmatprep.subr.bf16.mxu1 %v3458_v0 }
 0x11d   :  { %2829 = vmatpush3.bf16.msra.mxu0 %v3608_v9  ;;  %2849 = vmatpush3.bf16.msra.mxu1 %v3612_v10 }
 0x11e   :  { %2830 = vmatprep.subr.bf16.mxu0 %v3458_v0  ;;  %2850 = vmatprep.subr.bf16.mxu1 %v3458_v0 }
 0x121   :  { %2831 = vmatpush3.bf16.msra.mxu0 %v3616_v11  ;;  %2851 = vmatpush3.bf16.msra.mxu1 %v3620_v12 }
 0x122   :  { %2832 = vmatprep.subr.bf16.mxu0 %v3458_v0  ;;  %2852 = vmatprep.subr.bf16.mxu1 %v3458_v0 }
 0x125   :  { %2833 = vmatpush3.bf16.msra.mxu0 %v3624_v13  ;;  %2853 = vmatpush3.bf16.msra.mxu1 %v3628_v14 }
 0x126   :  { %2834 = vmatprep.subr.bf16.mxu0 %v3458_v0  ;;  %2854 = vmatprep.subr.bf16.mxu1 %v3458_v0 }
 0x129   :  { %2835 = vmatpush3.bf16.msra.mxu0 %v3631_v15  ;;  %2855 = vmatpush3.bf16.msra.mxu1 %v3633_v16 }
 0x12a   :  { %2860 = vmatprep.subr.bf16.mxu0 %v3458_v0  ;;  %2880 = vmatprep.subr.bf16.mxu1 %v3458_v0 }
 0x12c   :  { %2837 = vmatmul.mubr.bf16.vlgmr.msra.gmra.mrb[24].mxu0 %v101_v34  ;;  %2857 = vmatmul.mubr.bf16.vlgmr.msra.gmra.mrb[24].mxu1 %v99_v33  ;;  %v4072_v33 = vld [vmem:[#allocation7 + $0x98] sm:$0xff]   ;;  %v4076_v34 = vld [vmem:[#allocation7 + $0x20] sm:$0xff]  }
 0x12d   :  { %2861 = vmatpush3.bf16.msra.mxu0 %v3639_v18  ;;  %2881 = vmatpush3.bf16.msra.mxu1 %v3579_v1 }
 0x12e   :  { %2862 = vmatprep.subr.bf16.mxu0 %v3458_v0  ;;  %2882 = vmatprep.subr.bf16.mxu1 %v3458_v0 }
 0x12f   :  { %2876 = vmatprep.mubr.msk.bf16.mxu0 %vm3459_vm0, %v3458_v0  ;;  %2896 = vmatprep.mubr.msk.bf16.mxu1 %vm3459_vm0, %v3458_v0 }
 0x131   :  { %2863 = vmatpush3.bf16.msra.mxu0 %v3645_v20  ;;  %2883 = vmatpush3.bf16.msra.mxu1 %v3584_v3 }
 0x132   :  { %2864 = vmatprep.subr.bf16.mxu0 %v3458_v0  ;;  %2884 = vmatprep.subr.bf16.mxu1 %v3458_v0 }
 0x135   :  { %2865 = vmatpush3.bf16.msra.mxu0 %v3651_v21  ;;  %2885 = vmatpush3.bf16.msra.mxu1 %v3592_v5 }
 0x136   :  { %2866 = vmatprep.subr.bf16.mxu0 %v3458_v0  ;;  %2886 = vmatprep.subr.bf16.mxu1 %v3458_v0 }
 0x139   :  { %2867 = vmatpush3.bf16.msra.mxu0 %v3661_v22  ;;  %2887 = vmatpush3.bf16.msra.mxu1 %v3600_v7 }
 0x13a   :  { %2868 = vmatprep.subr.bf16.mxu0 %v3458_v0  ;;  %2888 = vmatprep.subr.bf16.mxu1 %v3458_v0 }
 0x13d   :  { %2869 = vmatpush3.bf16.msra.mxu0 %v3667_v23  ;;  %2889 = vmatpush3.bf16.msra.mxu1 %v3608_v9 }
 0x13e   :  { %2870 = vmatprep.subr.bf16.mxu0 %v3458_v0  ;;  %2890 = vmatprep.subr.bf16.mxu1 %v3458_v0 }
 0x13f   :  { %v251_v35 = vpop.f32.mrb[0].mxu0  ;;  %v339_v37 = vpop.f32.mrb[0].mxu1 }
 0x140   :  { %v2598_v36 = vpop.f32.mrb[1].mxu0  ;;  %v340_v38 = vadd.f32 %v339_v37, %v251_v35  ;;  %v2618_v40 = vpop.f32.mrb[1].mxu1  ;;  %v4080_v35 = vld [vmem:[#allocation7 + $0xa0] sm:$0xff]   ;;  %v4088_v37 = vld [vmem:[#allocation7 + $0xa8] sm:$0xff]  }
 0x141   :  { %v254_v39 = vpop.f32.mrb[2].mxu0  ;;  %2871 = vmatpush3.bf16.msra.mxu0 %v3673_v24  ;;  %2891 = vmatpush3.bf16.msra.mxu1 %v3616_v11  ;;  %v342_v42 = vpop.f32.mrb[2].mxu1  ;;  %v4084_v36 = vld [vmem:[#allocation7 + $0x28] sm:$0xff]  }
 0x142   :  { %v2599_v41 = vpop.f32.mrb[3].mxu0  ;;  %2872 = vmatprep.subr.bf16.mxu0 %v3458_v0  ;;  %2892 = vmatprep.subr.bf16.mxu1 %v3458_v0  ;;  %v2619_v43 = vpop.f32.mrb[3].mxu1 }
 0x143   :  { %v4092_v43 = vld [vmem:[#allocation7 + $0x30] sm:$0xff]  }
 0x145   :  { %2873 = vmatpush3.bf16.msra.mxu0 %v3680_v25  ;;  %2893 = vmatpush3.bf16.msra.mxu1 %v3624_v13 }
 0x146   :  { %2874 = vmatprep.subr.bf16.mxu0 %v3458_v0  ;;  %2894 = vmatprep.subr.bf16.mxu1 %v3458_v0 }
 0x149   :  { %2875 = vmatpush3.bf16.msra.mxu0 %v3686_v26  ;;  %2895 = vmatpush3.bf16.msra.mxu1 %v3631_v15 }
 0x14a   :  { %2900 = vmatprep.subr.bf16.mxu0 %v3458_v0  ;;  %2920 = vmatprep.subr.bf16.mxu1 %v3458_v0 }
 0x14c   :  { %2877 = vmatmul.mubr.bf16.vlgmr.msra.gmra.mrb[28].mxu0 %v103_v44  ;;  %2897 = vmatmul.mubr.bf16.vlgmr.msra.gmra.mrb[28].mxu1 %v105_v45 }
 0x14d   :  { %2901 = vmatpush3.bf16.msra.mxu0 %v3581_v2  ;;  %2921 = vmatpush3.bf16.msra.mxu1 %v3639_v18 }
 0x14e   :  { %2902 = vmatprep.subr.bf16.mxu0 %v3458_v0  ;;  %2922 = vmatprep.subr.bf16.mxu1 %v3458_v0 }
 0x14f   :  { %2916 = vmatprep.mubr.msk.bf16.mxu0 %vm3459_vm0, %v3458_v0  ;;  %2936 = vmatprep.mubr.msk.bf16.mxu1 %vm3459_vm0, %v3458_v0 }
 0x151   :  { %2903 = vmatpush3.bf16.msra.mxu0 %v3588_v4  ;;  %2923 = vmatpush3.bf16.msra.mxu1 %v3645_v20 }
 0x152   :  { %2904 = vmatprep.subr.bf16.mxu0 %v3458_v0  ;;  %2924 = vmatprep.subr.bf16.mxu1 %v3458_v0 }
 0x155   :  { %2905 = vmatpush3.bf16.msra.mxu0 %v3596_v6  ;;  %2925 = vmatpush3.bf16.msra.mxu1 %v3651_v21 }
 0x156   :  { %2906 = vmatprep.subr.bf16.mxu0 %v3458_v0  ;;  %2926 = vmatprep.subr.bf16.mxu1 %v3458_v0 }
 0x159   :  { %2907 = vmatpush3.bf16.msra.mxu0 %v3604_v8  ;;  %2927 = vmatpush3.bf16.msra.mxu1 %v3661_v22 }
 0x15a   :  { %2908 = vmatprep.subr.bf16.mxu0 %v3458_v0  ;;  %2928 = vmatprep.subr.bf16.mxu1 %v3458_v0 }
 0x15d   :  { %2909 = vmatpush3.bf16.msra.mxu0 %v3612_v10  ;;  %2929 = vmatpush3.bf16.msra.mxu1 %v3667_v23 }
 0x15e   :  { %2910 = vmatprep.subr.bf16.mxu0 %v3458_v0  ;;  %2930 = vmatprep.subr.bf16.mxu1 %v3458_v0 }
 0x15f   :  { %v427_v46 = vpop.f32.mrb[4].mxu0  ;;  %v471_v49 = vpop.f32.mrb[4].mxu1 }
 0x160   :  { %v3935_v47 = vadd.f32 %v427_v46, %v340_v38  ;;  %v2638_v48 = vpop.f32.mrb[5].mxu0  ;;  %v2658_v51 = vpop.f32.mrb[5].mxu1 }
 0x161   :  { %v430_v50 = vpop.f32.mrb[6].mxu0  ;;  %2911 = vmatpush3.bf16.msra.mxu0 %v3620_v12  ;;  %2931 = vmatpush3.bf16.msra.mxu1 %v3673_v24  ;;  %v474_v53 = vpop.f32.mrb[6].mxu1  ;;  %v4098_v48 = vld [vmem:[#allocation7 + $0xb0] sm:$0xff]  }
 0x162   :  { %v2639_v52 = vpop.f32.mrb[7].mxu0  ;;  %2912 = vmatprep.subr.bf16.mxu0 %v3458_v0  ;;  %2932 = vmatprep.subr.bf16.mxu1 %v3458_v0  ;;  %v2659_v54 = vpop.f32.mrb[7].mxu1 }
 0x163   :  { %v4103_v52 = vld [vmem:[#allocation7 + $0x38] sm:$0xff]  }
 0x165   :  { %2913 = vmatpush3.bf16.msra.mxu0 %v3628_v14  ;;  %2933 = vmatpush3.bf16.msra.mxu1 %v3680_v25 }
 0x166   :  { %2914 = vmatprep.subr.bf16.mxu0 %v3458_v0  ;;  %2934 = vmatprep.subr.bf16.mxu1 %v3458_v0 }
 0x169   :  { %2915 = vmatpush3.bf16.msra.mxu0 %v3633_v16  ;;  %2935 = vmatpush3.bf16.msra.mxu1 %v3686_v26 }
 0x16a   :  { %2940 = vmatprep.subr.bf16.mxu0 %v3458_v0  ;;  %2960 = vmatprep.subr.bf16.mxu1 %v3458_v0 }
 0x16c   :  { %2917 = vmatmul.mubr.bf16.vlgmr.msra.gmra.mrb[32].mxu0 %v103_v44  ;;  %2937 = vmatmul.mubr.bf16.vlgmr.msra.gmra.mrb[32].mxu1 %v107_v55 }
 0x16d   :  { %2941 = vmatpush3.bf16.msra.mxu0 %v3579_v1  ;;  %2961 = vmatpush3.bf16.msra.mxu1 %v3581_v2 }
 0x16e   :  { %2942 = vmatprep.subr.bf16.mxu0 %v3458_v0  ;;  %2962 = vmatprep.subr.bf16.mxu1 %v3458_v0 }
 0x16f   :  { %2956 = vmatprep.mubr.msk.bf16.mxu0 %vm3459_vm0, %v3458_v0  ;;  %2976 = vmatprep.mubr.msk.bf16.mxu1 %vm3459_vm0, %v3458_v0 }
 0x171   :  { %2943 = vmatpush3.bf16.msra.mxu0 %v3584_v3  ;;  %2963 = vmatpush3.bf16.msra.mxu1 %v3588_v4  ;;  %v109_v3 = vld [vmem:[#allocation2 + $0x34] sm:$0xf]  ;;  %v3984_v4 = vld [vmem:[#allocation7 + $0x40] sm:$0xff]  }
 0x172   :  { %2944 = vmatprep.subr.bf16.mxu0 %v3458_v0  ;;  %2964 = vmatprep.subr.bf16.mxu1 %v3458_v0 }
 0x175   :  { %2945 = vmatpush3.bf16.msra.mxu0 %v3592_v5  ;;  %2965 = vmatpush3.bf16.msra.mxu1 %v3596_v6  ;;  %v3990_v5 = vld [vmem:[#allocation7 + $0x48] sm:$0xff]   ;;  %v4000_v6 = vld [vmem:[#allocation7 + $0x50] sm:$0xff]  }
 0x176   :  { %2946 = vmatprep.subr.bf16.mxu0 %v3458_v0  ;;  %2966 = vmatprep.subr.bf16.mxu1 %v3458_v0 }
 0x179   :  { %2947 = vmatpush3.bf16.msra.mxu0 %v3600_v7  ;;  %2967 = vmatpush3.bf16.msra.mxu1 %v3604_v8  ;;  %v4006_v7 = vld [vmem:[#allocation7 + $0x58] sm:$0xff]   ;;  %v4012_v8 = vld [vmem:[#allocation7 + $0x60] sm:$0xff]  }
 0x17a   :  { %2948 = vmatprep.subr.bf16.mxu0 %v3458_v0  ;;  %2968 = vmatprep.subr.bf16.mxu1 %v3458_v0 }
 0x17d   :  { %2949 = vmatpush3.bf16.msra.mxu0 %v3608_v9  ;;  %2969 = vmatpush3.bf16.msra.mxu1 %v3612_v10  ;;  %v4018_v9 = vld [vmem:[#allocation7 + $0x68] sm:$0xff]  }
 0x17e   :  { %2950 = vmatprep.subr.bf16.mxu0 %v3458_v0  ;;  %2970 = vmatprep.subr.bf16.mxu1 %v3458_v0 }
 0x17f   :  { %v511_v56 = vpop.f32.mrb[8].mxu0  ;;  %v551_v59 = vpop.f32.mrb[8].mxu1 }
 0x180   :  { %v512_v57 = vadd.f32 %v511_v56, %v471_v49  ;;  %v2678_v58 = vpop.f32.mrb[9].mxu0  ;;  %v2698_v61 = vpop.f32.mrb[9].mxu1 }
 0x181   :  { %v514_v60 = vpop.f32.mrb[10].mxu0  ;;  %2951 = vmatpush3.bf16.msra.mxu0 %v3616_v11  ;;  %2971 = vmatpush3.bf16.msra.mxu1 %v3620_v12  ;;  %v554_v1 = vpop.f32.mrb[10].mxu1 }
 0x182   :  { %v557_v62 = vadd.f32 %v551_v59, %v512_v57  ;;  %v2679_v63 = vpop.f32.mrb[11].mxu0  ;;  %2952 = vmatprep.subr.bf16.mxu0 %v3458_v0  ;;  %2972 = vmatprep.subr.bf16.mxu1 %v3458_v0  ;;  %v2699_v2 = vpop.f32.mrb[11].mxu1 }
 0x185   :  { %2953 = vmatpush3.bf16.msra.mxu0 %v3624_v13  ;;  %2973 = vmatpush3.bf16.msra.mxu1 %v3628_v14 }
 0x186   :  { %2954 = vmatprep.subr.bf16.mxu0 %v3458_v0  ;;  %2974 = vmatprep.subr.bf16.mxu1 %v3458_v0 }
 0x189   :  { %2955 = vmatpush3.bf16.msra.mxu0 %v3631_v15  ;;  %2975 = vmatpush3.bf16.msra.mxu1 %v3633_v16  ;;  %v4025_v16 = vld [vmem:[%s4402_s2] ss:$0 sm:$0xff] }
 0x18a   :  { %2980 = vmatprep.subr.bf16.mxu0 %v3458_v0  ;;  %3000 = vmatprep.subr.bf16.mxu1 %v3458_v0  ;;  %v434_v45 = vadd.f32 %v4025_v16, %v3935_v47  ;;  %v4107_v47 = vld [vmem:[#allocation7 + $0xb8] sm:$0xff]  }
 0x18c   :  { %2957 = vmatmul.mubr.bf16.vlgmr.msra.gmra.mrb[36].mxu0 %v109_v3  ;;  %2977 = vmatmul.mubr.bf16.vlgmr.msra.gmra.mrb[36].mxu1 %v107_v55  ;;  %v435_v53 = vmax.f32 %v434_v45, 0.0 }
 0x18d   :  { %2981 = vmatpush3.bf16.msra.mxu0 %v3639_v18  ;;  %3001 = vmatpush3.bf16.msra.mxu1 %v3984_v4  ;;  %v4029_v18 = vld [vmem:[#allocation7 + $0x70] sm:$0xff]  }
 0x18e   :  { %2982 = vmatprep.subr.bf16.mxu0 %v3458_v0  ;;  %3002 = vmatprep.subr.bf16.mxu1 %v3458_v0  ;;  %v436_v55 = vpack.c.bf16 %v435_v53, %v435_v53 }
 0x18f   :  { %2996 = vmatprep.mubr.msk.bf16.mxu0 %vm3459_vm0, %v3458_v0  ;;  %3016 = vmatprep.mubr.msk.bf16.mxu1 %vm3459_vm0, %v3458_v0 }
 0x191   :  { %2983 = vmatpush3.bf16.msra.mxu0 %v3645_v20  ;;  %3003 = vmatpush3.bf16.msra.mxu1 %v3990_v5  ;;  %v558_v20 = vadd.f32 %v4025_v16, %v557_v62 }
 0x192   :  { %2984 = vmatprep.subr.bf16.mxu0 %v3458_v0  ;;  %3004 = vmatprep.subr.bf16.mxu1 %v3458_v0 }
 0x195   :  { %2985 = vmatpush3.bf16.msra.mxu0 %v3651_v21  ;;  %3005 = vmatpush3.bf16.msra.mxu1 %v4000_v6 }
 0x196   :  { %2986 = vmatprep.subr.bf16.mxu0 %v3458_v0  ;;  %3006 = vmatprep.subr.bf16.mxu1 %v3458_v0 }
 0x199   :  { %2987 = vmatpush3.bf16.msra.mxu0 %v3661_v22  ;;  %3007 = vmatpush3.bf16.msra.mxu1 %v4006_v7  ;;  %v4036_v22 = vld [vmem:[#allocation7 + $0x78] sm:$0xff]  }
 0x19a   :  { %2988 = vmatprep.subr.bf16.mxu0 %v3458_v0  ;;  %3008 = vmatprep.subr.bf16.mxu1 %v3458_v0 }
 0x19d   :  { %2989 = vmatpush3.bf16.msra.mxu0 %v3667_v23  ;;  %3009 = vmatpush3.bf16.msra.mxu1 %v4012_v8  ;;  %v559_v23 = vmax.f32 %v558_v20, 0.0 }
 0x19e   :  { %2990 = vmatprep.subr.bf16.mxu0 %v3458_v0  ;;  %3010 = vmatprep.subr.bf16.mxu1 %v3458_v0 }
 0x19f   :  { %v595_v10 = vpop.f32.mrb[12].mxu0  ;;  %v635_v12 = vpop.f32.mrb[12].mxu1 }
 0x1a0   :  { %v2718_v11 = vpop.f32.mrb[13].mxu0  ;;  %v636_v13 = vadd.f32 %v635_v12, %v595_v10  ;;  %v2738_v15 = vpop.f32.mrb[13].mxu1 }
 0x1a1   :  { %v598_v14 = vpop.f32.mrb[14].mxu0  ;;  %2991 = vmatpush3.bf16.msra.mxu0 %v3673_v24  ;;  %3011 = vmatpush3.bf16.msra.mxu1 %v4018_v9  ;;  %v638_v19 = vpop.f32.mrb[14].mxu1  ;;  %v111_v24 = vld [vmem:[#allocation2 + $0x38] sm:$0xf] }
 0x1a2   :  { %v2719_v17 = vpop.f32.mrb[15].mxu0  ;;  %2992 = vmatprep.subr.bf16.mxu0 %v3458_v0  ;;  %3012 = vmatprep.subr.bf16.mxu1 %v3458_v0  ;;  %v2739_v21 = vpop.f32.mrb[15].mxu1 }
 0x1a5   :  { %2993 = vmatpush3.bf16.msra.mxu0 %v3680_v25  ;;  %3013 = vmatpush3.bf16.msra.mxu1 %v4029_v18  ;;  %v560_v25 = vpack.c.bf16 %v559_v23, %v559_v23 }
 0x1a6   :  { %2994 = vmatprep.subr.bf16.mxu0 %v3458_v0  ;;  %3014 = vmatprep.subr.bf16.mxu1 %v3458_v0 }
 0x1a9   :  { %2995 = vmatpush3.bf16.msra.mxu0 %v3686_v26  ;;  %3015 = vmatpush3.bf16.msra.mxu1 %v4036_v22  ;;  %v4052_v26 = vld [vmem:[#allocation7 + $0x88] sm:$0xff]  }
 0x1aa   :  { %3020 = vmatprep.subr.bf16.mxu0 %v3458_v0  ;;  %3040 = vmatprep.subr.bf16.mxu1 %v3458_v0 }
 0x1ac   :  { %2997 = vmatmul.mubr.bf16.vlgmr.msra.gmra.mrb[40].mxu0 %v111_v24  ;;  %3017 = vmatmul.mubr.bf16.vlgmr.msra.gmra.mrb[40].mxu1 %v560_v25 }
 0x1ad   :  { %3021 = vmatpush3.bf16.msra.mxu0 %v4040_v27  ;;  %3041 = vmatpush3.bf16.msra.mxu1 %v4044_v28 }
 0x1ae   :  { %3022 = vmatprep.subr.bf16.mxu0 %v3458_v0  ;;  %3042 = vmatprep.subr.bf16.mxu1 %v3458_v0 }
 0x1af   :  { %3036 = vmatprep.mubr.msk.bf16.mxu0 %vm3459_vm0, %v3458_v0  ;;  %3056 = vmatprep.mubr.msk.bf16.mxu1 %vm3459_vm0, %v3458_v0 }
 0x1b1   :  { %3023 = vmatpush3.bf16.msra.mxu0 %v4048_v29  ;;  %3043 = vmatpush3.bf16.msra.mxu1 %v4052_v26 }
 0x1b2   :  { %3024 = vmatprep.subr.bf16.mxu0 %v3458_v0  ;;  %3044 = vmatprep.subr.bf16.mxu1 %v3458_v0 }
 0x1b5   :  { %3025 = vmatpush3.bf16.msra.mxu0 %v4060_v30  ;;  %3045 = vmatpush3.bf16.msra.mxu1 %v4064_v31 }
 0x1b6   :  { %3026 = vmatprep.subr.bf16.mxu0 %v3458_v0  ;;  %3046 = vmatprep.subr.bf16.mxu1 %v3458_v0 }
 0x1b9   :  { %3027 = vmatpush3.bf16.msra.mxu0 %v4068_v32  ;;  %3047 = vmatpush3.bf16.msra.mxu1 %v4072_v33 }
 0x1ba   :  { %3028 = vmatprep.subr.bf16.mxu0 %v3458_v0  ;;  %3048 = vmatprep.subr.bf16.mxu1 %v3458_v0 }
 0x1bd   :  { %3029 = vmatpush3.bf16.msra.mxu0 %v4076_v34  ;;  %3049 = vmatpush3.bf16.msra.mxu1 %v4080_v35 }
 0x1be   :  { %3030 = vmatprep.subr.bf16.mxu0 %v3458_v0  ;;  %3050 = vmatprep.subr.bf16.mxu1 %v3458_v0 }
 0x1bf   :  { %v675_v38 = vpop.f32.mrb[16].mxu0  ;;  %v719_v41 = vpop.f32.mrb[16].mxu1 }
 0x1c0   :  { %v681_v39 = vadd.f32 %v675_v38, %v636_v13  ;;  %v2758_v40 = vpop.f32.mrb[17].mxu0  ;;  %v2778_v44 = vpop.f32.mrb[17].mxu1 }
 0x1c1   :  { %v678_v42 = vpop.f32.mrb[18].mxu0  ;;  %3031 = vmatpush3.bf16.msra.mxu0 %v4084_v36  ;;  %3051 = vmatpush3.bf16.msra.mxu1 %v4088_v37  ;;  %v722_v49 = vpop.f32.mrb[18].mxu1 }
 0x1c2   :  { %v2759_v46 = vpop.f32.mrb[19].mxu0  ;;  %3032 = vmatprep.subr.bf16.mxu0 %v3458_v0  ;;  %v682_v50 = vadd.f32 %v4025_v16, %v681_v39  ;;  %3052 = vmatprep.subr.bf16.mxu1 %v3458_v0  ;;  %v2779_v51 = vpop.f32.mrb[19].mxu1 }
 0x1c4   :  { %v683_v54 = vmax.f32 %v682_v50, 0.0  ;;  %v4208_v50 = vld [vmem:[#allocation8] ss:$12 sps:$4 sm:$0xff]  }
 0x1c5   :  { %3033 = vmatpush3.bf16.msra.mxu0 %v4092_v43  ;;  %3053 = vmatpush3.bf16.msra.mxu1 %v4098_v48 }
 0x1c6   :  { %3034 = vmatprep.subr.bf16.mxu0 %v3458_v0  ;;  %3054 = vmatprep.subr.bf16.mxu1 %v3458_v0  ;;  %v684_v56 = vpack.c.bf16 %v683_v54, %v683_v54  ;;  %v4214_v54 = vld [vmem:[#allocation8 + $0x18] ss:$12 sps:$4 sm:$0xff]  }
 0x1c9   :  { %3035 = vmatpush3.bf16.msra.mxu0 %v4103_v52  ;;  %3055 = vmatpush3.bf16.msra.mxu1 %v4107_v47 }
 0x1ca   :  { %3060 = vmatprep.subr.bf16.mxu0 %v3458_v0  ;;  %3080 = vmatprep.subr.bf16.mxu1 %v3458_v0 }
 0x1cc   :  { %3037 = vmatmul.mubr.bf16.vlgmr.msra.gmra.mrb[44].mxu0 %v436_v55  ;;  %3057 = vmatmul.mubr.bf16.vlgmr.msra.gmra.mrb[44].mxu1 %v684_v56  ;;  %v3460_v55 = vmov 0  }
 0x1cd   :  { %3061 = vmatpush3.bf16.msra.mxu0 %v3984_v4  ;;  %3081 = vmatpush3.bf16.msra.mxu1 %v4040_v27 }
 0x1ce   :  { %3062 = vmatprep.subr.bf16.mxu0 %v3458_v0  ;;  %3082 = vmatprep.subr.bf16.mxu1 %v3458_v0 }
 0x1cf   :  { %3076 = vmatprep.mubr.msk.bf16.mxu0 %vm3459_vm0, %v3458_v0  ;;  %3096 = vmatprep.mubr.msk.bf16.mxu1 %vm3459_vm0, %v3458_v0 }
 0x1d1   :  { %3063 = vmatpush3.bf16.msra.mxu0 %v3990_v5  ;;  %3083 = vmatpush3.bf16.msra.mxu1 %v4048_v29 }
 0x1d2   :  { %3064 = vmatprep.subr.bf16.mxu0 %v3458_v0  ;;  %3084 = vmatprep.subr.bf16.mxu1 %v3458_v0 }
 0x1d5   :  { %3065 = vmatpush3.bf16.msra.mxu0 %v4000_v6  ;;  %3085 = vmatpush3.bf16.msra.mxu1 %v4060_v30 }
 0x1d6   :  { %3066 = vmatprep.subr.bf16.mxu0 %v3458_v0  ;;  %3086 = vmatprep.subr.bf16.mxu1 %v3458_v0 }
 0x1d9   :  { %3067 = vmatpush3.bf16.msra.mxu0 %v4006_v7  ;;  %3087 = vmatpush3.bf16.msra.mxu1 %v4068_v32 }
 0x1da   :  { %3068 = vmatprep.subr.bf16.mxu0 %v3458_v0  ;;  %3088 = vmatprep.subr.bf16.mxu1 %v3458_v0 }
 0x1dd   :  { %3069 = vmatpush3.bf16.msra.mxu0 %v4012_v8  ;;  %3089 = vmatpush3.bf16.msra.mxu1 %v4076_v34 }
 0x1de   :  { %3070 = vmatprep.subr.bf16.mxu0 %v3458_v0  ;;  %3090 = vmatprep.subr.bf16.mxu1 %v3458_v0 }
 0x1df   :  { %v759_v57 = vpop.f32.mrb[20].mxu0  ;;  %v799_v60 = vpop.f32.mrb[20].mxu1 }
 0x1e0   :  { %v760_v58 = vadd.f32 %v759_v57, %v719_v41  ;;  %v2798_v59 = vpop.f32.mrb[21].mxu0  ;;  %v2818_v62 = vpop.f32.mrb[21].mxu1  ;;  %v4228_v57 = vld [vmem:[#allocation8 + $0x4c] ss:$12 sps:$4 sm:$0xff]  }
 0x1e1   :  { %v762_v61 = vpop.f32.mrb[22].mxu0  ;;  %3071 = vmatpush3.bf16.msra.mxu0 %v4018_v9  ;;  %3091 = vmatpush3.bf16.msra.mxu1 %v4084_v36  ;;  %v802_v2 = vpop.f32.mrb[22].mxu1  ;;  %v4241_v59 = vld [vmem:[#allocation8 + $0x60] ss:$12 sps:$4 sm:$0xff]  }
 0x1e2   :  { %v805_v63 = vadd.f32 %v799_v60, %v760_v58  ;;  %v2799_v1 = vpop.f32.mrb[23].mxu0  ;;  %3072 = vmatprep.subr.bf16.mxu0 %v3458_v0  ;;  %3092 = vmatprep.subr.bf16.mxu1 %v3458_v0  ;;  %v2819_v3 = vpop.f32.mrb[23].mxu1  ;;  %v4236_v58 = vld [vmem:[#allocation8 + $0x64] ss:$12 sps:$4 sm:$0xff]  }
 0x1e3   :  { %v4249_v60 = vld [vmem:[#allocation8 + $0x78] ss:$12 sps:$4 sm:$0xff]   ;;  %v4257_v61 = vld [vmem:[#allocation8 + $0x90] ss:$12 sps:$4 sm:$0xff]  }
 0x1e4   :  { %v806_v10 = vadd.f32 %v4025_v16, %v805_v63 }
 0x1e5   :  { %3073 = vmatpush3.bf16.msra.mxu0 %v4029_v18  ;;  %3093 = vmatpush3.bf16.msra.mxu1 %v4092_v43 }
 0x1e6   :  { %v807_v11 = vmax.f32 %v806_v10, 0.0  ;;  %3074 = vmatprep.subr.bf16.mxu0 %v3458_v0  ;;  %3094 = vmatprep.subr.bf16.mxu1 %v3458_v0  ;;  %v4265_v10 = vld [vmem:[#allocation8 + $0xa8] ss:$12 sps:$4 sm:$0xff]  }
 0x1e8   :  { %v808_v12 = vpack.c.bf16 %v807_v11, %v807_v11 }
 0x1e9   :  { %3075 = vmatpush3.bf16.msra.mxu0 %v4036_v22  ;;  %3095 = vmatpush3.bf16.msra.mxu1 %v4103_v52 }
 0x1ea   :  { %3100 = vmatprep.subr.bf16.mxu0 %v3458_v0  ;;  %3120 = vmatprep.subr.bf16.mxu1 %v3458_v0 }
 0x1ec   :  { %3077 = vmatmul.mubr.bf16.vlgmr.msra.gmra.mrb[48].mxu0 %v808_v12  ;;  %3097 = vmatmul.mubr.bf16.vlgmr.msra.gmra.mrb[48].mxu1 %v684_v56  ;;  %v4225_v56 = vld [vmem:[#allocation8 + $0x30] ss:$12 sps:$4 sm:$0xff]  }
 0x1ed   :  { %3101 = vmatpush3.bf16.msra.mxu0 %v4044_v28  ;;  %3116 = vmatprep.mubr.msk.bf16.mxu0 %vm3459_vm0, %v3458_v0 }
 0x1ee   :  { %3102 = vmatprep.subr.bf16.mxu0 %v3458_v0  ;;  %3121 = vmatpush3.bf16.msra.mxu1 %v3984_v4 }
 0x1ef   :  { %3136 = vmatprep.mubr.msk.bf16.mxu1 %vm3459_vm0, %v3458_v0  ;;  %3122 = vmatprep.subr.bf16.mxu1 %v3458_v0 }
 0x1f1   :  { %3103 = vmatpush3.bf16.msra.mxu0 %v4052_v26 }
 0x1f2   :  { %3104 = vmatprep.subr.bf16.mxu0 %v3458_v0  ;;  %3123 = vmatpush3.bf16.msra.mxu1 %v3990_v5 }
 0x1f3   :  { %3124 = vmatprep.subr.bf16.mxu1 %v3458_v0 }
 0x1f5   :  { %3105 = vmatpush3.bf16.msra.mxu0 %v4064_v31 }
 0x1f6   :  { %3106 = vmatprep.subr.bf16.mxu0 %v3458_v0  ;;  %3125 = vmatpush3.bf16.msra.mxu1 %v4000_v6 }
 0x1f7   :  { %3126 = vmatprep.subr.bf16.mxu1 %v3458_v0 }
 0x1f9   :  { %3107 = vmatpush3.bf16.msra.mxu0 %v4072_v33 }
 0x1fa   :  { %3108 = vmatprep.subr.bf16.mxu0 %v3458_v0  ;;  %3127 = vmatpush3.bf16.msra.mxu1 %v4006_v7 }
 0x1fb   :  { %3128 = vmatprep.subr.bf16.mxu1 %v3458_v0 }
 0x1fd   :  { %3109 = vmatpush3.bf16.msra.mxu0 %v4080_v35 }
 0x1fe   :  { %3110 = vmatprep.subr.bf16.mxu0 %v3458_v0  ;;  %3129 = vmatpush3.bf16.msra.mxu1 %v4012_v8 }
 0x1ff   :  { %v843_v4 = vpop.f32.mrb[24].mxu0  ;;  %v883_v13 = vpop.f32.mrb[24].mxu1  ;;  %3130 = vmatprep.subr.bf16.mxu1 %v3458_v0 }
 0x200   :  { %v2838_v5 = vpop.f32.mrb[25].mxu0  ;;  %v884_v6 = vadd.f32 %v883_v13, %v843_v4  ;;  %v2858_v15 = vpop.f32.mrb[25].mxu1 }
 0x201   :  { %v846_v14 = vpop.f32.mrb[26].mxu0  ;;  %3111 = vmatpush3.bf16.msra.mxu0 %v4088_v37  ;;  %v886_v7 = vpop.f32.mrb[26].mxu1 }
 0x202   :  { %v2839_v17 = vpop.f32.mrb[27].mxu0  ;;  %3112 = vmatprep.subr.bf16.mxu0 %v3458_v0  ;;  %v2859_v19 = vpop.f32.mrb[27].mxu1  ;;  %3131 = vmatpush3.bf16.msra.mxu1 %v4018_v9 }
 0x203   :  { %3132 = vmatprep.subr.bf16.mxu1 %v3458_v0 }
 0x205   :  { %3113 = vmatpush3.bf16.msra.mxu0 %v4098_v48 }
 0x206   :  { %3114 = vmatprep.subr.bf16.mxu0 %v3458_v0  ;;  %3133 = vmatpush3.bf16.msra.mxu1 %v4029_v18 }
 0x207   :  { %3134 = vmatprep.subr.bf16.mxu1 %v3458_v0 }
 0x209   :  { %3115 = vmatpush3.bf16.msra.mxu0 %v4107_v47 }
 0x20a   :  { %3140 = vmatprep.subr.bf16.mxu0 %v3458_v0  ;;  %3135 = vmatpush3.bf16.msra.mxu1 %v4036_v22 }
 0x20b   :  { %3160 = vmatprep.subr.bf16.mxu1 %v3458_v0 }
 0x21f   :  { %v923_v8 = vpop.f32.mrb[28].mxu0  ;;  %v967_v21 = vpop.f32.mrb[28].mxu1 }
 0x220   :  { %v929_v9 = vadd.f32 %v923_v8, %v884_v6  ;;  %v2878_v20 = vpop.f32.mrb[29].mxu0  ;;  %v2898_v24 = vpop.f32.mrb[29].mxu1 }
 0x221   :  { %v926_v23 = vpop.f32.mrb[30].mxu0  ;;  %v970_v18 = vpop.f32.mrb[30].mxu1  ;;  %v4296_v24 = vld [vmem:[#allocation8 + $0x80] ss:$12 sps:$4 sm:$0xff]  }
 0x222   :  { %v930_v25 = vadd.f32 %v4025_v16, %v929_v9  ;;  %v2879_v38 = vpop.f32.mrb[31].mxu0  ;;  %v2899_v39 = vpop.f32.mrb[31].mxu1  ;;  %v4275_v9 = vld [vmem:[#allocation8 + $0x8] ss:$12 sps:$4 sm:$0xff]  }
 0x223   :  { %v4292_v23 = vld [vmem:[#allocation8 + $0x68] ss:$12 sps:$4 sm:$0xff]  }
 0x224   :  { %v931_v40 = vmax.f32 %v930_v25, 0.0  ;;  %v4300_v25 = vld [vmem:[#allocation8 + $0x98] ss:$12 sps:$4 sm:$0xff]  }
 0x226   :  { %v932_v41 = vpack.c.bf16 %v931_v40, %v931_v40 }
 0x228   :  { %3117 = vmatmul.mubr.bf16.vlgmr.msra.gmra.mrb[52].mxu0 %v932_v41 }
 0x229   :  { %3141 = vmatpush3.bf16.msra.mxu0 %v4040_v27  ;;  %3156 = vmatprep.mubr.msk.bf16.mxu0 %vm3459_vm0, %v3458_v0 }
 0x22a   :  { %3142 = vmatprep.subr.bf16.mxu0 %v3458_v0 }
 0x22d   :  { %3143 = vmatpush3.bf16.msra.mxu0 %v4048_v29 }
 0x22e   :  { %3144 = vmatprep.subr.bf16.mxu0 %v3458_v0 }
 0x231   :  { %3145 = vmatpush3.bf16.msra.mxu0 %v4060_v30 }
 0x232   :  { %3146 = vmatprep.subr.bf16.mxu0 %v3458_v0 }
 0x235   :  { %3147 = vmatpush3.bf16.msra.mxu0 %v4068_v32 }
 0x236   :  { %3148 = vmatprep.subr.bf16.mxu0 %v3458_v0 }
 0x239   :  { %3149 = vmatpush3.bf16.msra.mxu0 %v4076_v34  ;;  %v4204_v34 = vld [vmem:[#allocation8 + $0x4] ss:$12 sps:$4 sm:$0xff]  }
 0x23a   :  { %3150 = vmatprep.subr.bf16.mxu0 %v3458_v0 }
 0x23d   :  { %3151 = vmatpush3.bf16.msra.mxu0 %v4084_v36 }
 0x23e   :  { %3152 = vmatprep.subr.bf16.mxu0 %v3458_v0 }
 0x23f   :  { %v1007_v22 = vpop.f32.mrb[32].mxu0  ;;  %v1047_v42 = vpop.f32.mrb[32].mxu1 }
 0x240   :  { %v1008_v27 = vadd.f32 %v1007_v22, %v967_v21  ;;  %v2918_v29 = vpop.f32.mrb[33].mxu0  ;;  %v2938_v44 = vpop.f32.mrb[33].mxu1  ;;  %v4288_v21 = vld [vmem:[#allocation8 + $0x50] ss:$12 sps:$4 sm:$0xff]  }
 0x241   :  { %3153 = vmatpush3.bf16.msra.mxu0 %v4092_v43  ;;  %v1010_v30 = vpop.f32.mrb[34].mxu0  ;;  %v1050_v46 = vpop.f32.mrb[34].mxu1  ;;  %v4211_v43 = vld [vmem:[#allocation8 + $0x1c] ss:$12 sps:$4 sm:$0xff]  }
 0x242   :  { %v1053_v45 = vadd.f32 %v1047_v42, %v1008_v27  ;;  %v2919_v32 = vpop.f32.mrb[35].mxu0  ;;  %3154 = vmatprep.subr.bf16.mxu0 %v3458_v0  ;;  %v2939_v49 = vpop.f32.mrb[35].mxu1  ;;  %v4309_v29 = vld [vmem:[#allocation8 + $0xb0] ss:$12 sps:$4 sm:$0xff]  }
 0x244   :  { %v1054_v36 = vadd.f32 %v4025_v16, %v1053_v45 }
 0x245   :  { %3155 = vmatpush3.bf16.msra.mxu0 %v4103_v52  ;;  %v4218_v52 = vld [vmem:[#allocation8 + $0x34] ss:$12 sps:$4 sm:$0xff]  }
 0x246   :  { %v1055_v51 = vmax.f32 %v1054_v36, 0.0  ;;  %1931 = vmatprep.subr.bf16.mxu0 %v4204_v34 }
 0x248   :  { %v1056_v53 = vpack.c.bf16 %v1055_v51, %v1055_v51  ;;  %3157 = vmatmul.mubr.bf16.vlgmr.msra.gmra.mrb[56].mxu0 %v932_v41  ;;  %v4306_v41 = vld [vmem:[%s4404_s4] ss:$0 sm:$0xff] }
 0x249   :  { %1932 = vmatpush1.bf16.msra.mxu0 %v4208_v50  ;;  %1963 = vmatprep.mubr.bf16.mxu0 %v3460_v55 }
 0x24a   :  { %3137 = vmatmul.mubr.bf16.vlgmr.msra.gmra.mrb[52].mxu1 %v1056_v53  ;;  %1933 = vmatprep.subr.bf16.mxu0 %v4211_v43 }
 0x24b   :  { %3161 = vmatpush3.bf16.msra.mxu1 %v4044_v28  ;;  %3176 = vmatprep.mubr.msk.bf16.mxu1 %vm3459_vm0, %v3458_v0  ;;  %v4233_v28 = vld [vmem:[#allocation8 + $0x48] ss:$12 sps:$4 sm:$0xff]  }
 0x24c   :  { %3162 = vmatprep.subr.bf16.mxu1 %v3458_v0 }
 0x24d   :  { %1934 = vmatpush1.bf16.msra.mxu0 %v4214_v54 }
 0x24e   :  { %1935 = vmatprep.subr.bf16.mxu0 %v4218_v52 }
 0x24f   :  { %3163 = vmatpush3.bf16.msra.mxu1 %v4052_v26  ;;  %v4244_v26 = vld [vmem:[#allocation8 + $0x7c] ss:$12 sps:$4 sm:$0xff]  }
 0x250   :  { %3164 = vmatprep.subr.bf16.mxu1 %v3458_v0 }
 0x251   :  { %1936 = vmatpush1.bf16.msra.mxu0 %v4225_v56 }
 0x252   :  { %1937 = vmatprep.subr.bf16.mxu0 %v4228_v57 }
 0x253   :  { %3165 = vmatpush3.bf16.msra.mxu1 %v4064_v31  ;;  %v4252_v31 = vld [vmem:[#allocation8 + $0x94] ss:$12 sps:$4 sm:$0xff]  }
 0x254   :  { %3166 = vmatprep.subr.bf16.mxu1 %v3458_v0 }
 0x255   :  { %1938 = vmatpush1.bf16.msra.mxu0 %v4233_v28 }
 0x256   :  { %1939 = vmatprep.subr.bf16.mxu0 %v4236_v58 }
 0x257   :  { %3167 = vmatpush3.bf16.msra.mxu1 %v4072_v33  ;;  %v4260_v33 = vld [vmem:[#allocation8 + $0xac] ss:$12 sps:$4 sm:$0xff]  }
 0x258   :  { %3168 = vmatprep.subr.bf16.mxu1 %v3458_v0 }
 0x259   :  { %1940 = vmatpush1.bf16.msra.mxu0 %v4241_v59 }
 0x25a   :  { %1941 = vmatprep.subr.bf16.mxu0 %v4244_v26 }
 0x25b   :  { %3169 = vmatpush3.bf16.msra.mxu1 %v4080_v35 }
 0x25c   :  { %3170 = vmatprep.subr.bf16.mxu1 %v3458_v0 }
 0x25d   :  { %1942 = vmatpush1.bf16.msra.mxu0 %v4249_v60 }
 0x25e   :  { %1943 = vmatprep.subr.bf16.mxu0 %v4252_v31 }
 0x25f   :  { %v1091_v62 = vpop.f32.mrb[36].mxu0  ;;  %3171 = vmatpush3.bf16.msra.mxu1 %v4088_v37  ;;  %v1131_v1 = vpop.f32.mrb[36].mxu1 }
 0x260   :  { %v2958_v63 = vpop.f32.mrb[37].mxu0  ;;  %3172 = vmatprep.subr.bf16.mxu1 %v3458_v0  ;;  %v1132_v2 = vadd.f32 %v1131_v1, %v1091_v62  ;;  %v2978_v35 = vpop.f32.mrb[37].mxu1 }
 0x261   :  { %v1094_v3 = vpop.f32.mrb[38].mxu0  ;;  %1944 = vmatpush1.bf16.msra.mxu0 %v4257_v61  ;;  %v1134_v12 = vpop.f32.mrb[38].mxu1 }
 0x262   :  { %v2959_v11 = vpop.f32.mrb[39].mxu0  ;;  %1945 = vmatprep.subr.bf16.mxu0 %v4260_v33  ;;  %v2979_v4 = vpop.f32.mrb[39].mxu1 }
 0x263   :  { %3173 = vmatpush3.bf16.msra.mxu1 %v4098_v48 }
 0x264   :  { %3174 = vmatprep.subr.bf16.mxu1 %v3458_v0 }
 0x265   :  { %1946 = vmatpush1.bf16.msra.mxu0 %v4265_v10 }
 0x266   :  { %2015 = vmatprep.subr.bf16.mxu0 %v4204_v34 }
 0x267   :  { %3175 = vmatpush3.bf16.msra.mxu1 %v4107_v47  ;;  %v4278_v47 = vld [vmem:[#allocation8 + $0x20] ss:$12 sps:$4 sm:$0xff]  }
 0x268   :  { %3180 = vmatprep.subr.bf16.mxu1 %v3458_v0 }
 0x27f   :  { %v1171_v37 = vpop.f32.mrb[40].mxu0  ;;  %v1320_v13 = vpop.f32.mrb[40].mxu1 }
 0x280   :  { %v1177_v5 = vadd.f32 %v1171_v37, %v1132_v2  ;;  %v2998_v6 = vpop.f32.mrb[41].mxu0  ;;  %v3018_v14 = vpop.f32.mrb[41].mxu1 }
 0x281   :  { %v1174_v15 = vpop.f32.mrb[42].mxu0  ;;  %v1323_v7 = vpop.f32.mrb[42].mxu1 }
 0x282   :  { %v1178_v17 = vadd.f32 %v4025_v16, %v1177_v5  ;;  %v2999_v48 = vpop.f32.mrb[43].mxu0  ;;  %v3019_v19 = vpop.f32.mrb[43].mxu1  ;;  %v4284_v16 = vld [vmem:[#allocation8 + $0x38] ss:$12 sps:$4 sm:$0xff]  }
 0x284   :  { %v1179_v8 = vmax.f32 %v1178_v17, 0.0 }
 0x286   :  { %v1180_v20 = vpack.c.bf16 %v1179_v8, %v1179_v8 }
 0x288   :  { %3177 = vmatmul.mubr.bf16.vlgmr.msra.gmra.mrb[56].mxu1 %v1180_v20  ;;  %v1788_v20 = vlaneseq }
 0x289   :  { %3181 = vmatpush3.bf16.msra.mxu1 %v4275_v9  ;;  %3196 = vmatprep.mubr.msk.bf16.mxu1 %vm3459_vm0, %v3458_v0 }
 0x28a   :  { %3182 = vmatprep.subr.bf16.mxu1 %v3458_v0 }
 0x28d   :  { %3183 = vmatpush3.bf16.msra.mxu1 %v4278_v47 }
 0x28e   :  { %3184 = vmatprep.subr.bf16.mxu1 %v3458_v0 }
 0x291   :  { %3185 = vmatpush3.bf16.msra.mxu1 %v4284_v16 }
 0x292   :  { %3186 = vmatprep.subr.bf16.mxu1 %v3458_v0 }
 0x295   :  { %3187 = vmatpush3.bf16.msra.mxu1 %v4288_v21 }
 0x296   :  { %3188 = vmatprep.subr.bf16.mxu1 %v3458_v0 }
 0x299   :  { %3189 = vmatpush3.bf16.msra.mxu1 %v4292_v23 }
 0x29a   :  { %3190 = vmatprep.subr.bf16.mxu1 %v3458_v0 }
 0x29d   :  { %3191 = vmatpush3.bf16.msra.mxu1 %v4296_v24 }
 0x29e   :  { %3192 = vmatprep.subr.bf16.mxu1 %v3458_v0 }
 0x29f   :  { %v1408_v38 = vpop.f32.mrb[44].mxu0  ;;  %v1496_v39 = vpop.f32.mrb[44].mxu1 }
 0x2a0   :  { %v1409_v18 = vadd.f32 %v1408_v38, %v1320_v13  ;;  %v3038_v40 = vpop.f32.mrb[45].mxu0  ;;  %v3058_v22 = vpop.f32.mrb[45].mxu1 }
 0x2a1   :  { %v1411_v27 = vpop.f32.mrb[46].mxu0  ;;  %3193 = vmatpush3.bf16.msra.mxu1 %v4300_v25  ;;  %v1499_v30 = vpop.f32.mrb[46].mxu1 }
 0x2a2   :  { %v1502_v42 = vadd.f32 %v1496_v39, %v1409_v18  ;;  %v3039_v44 = vpop.f32.mrb[47].mxu0  ;;  %3194 = vmatprep.subr.bf16.mxu1 %v3458_v0  ;;  %v3059_v45 = vpop.f32.mrb[47].mxu1 }
 0x2a4   :  { %v1503_v32 = vadd.f32 %v4306_v41, %v1502_v42 }
 0x2a5   :  { %3195 = vmatpush3.bf16.msra.mxu1 %v4309_v29 }
 0x2a6   :  { %v1504_v46 = vmax.f32 %v1503_v32, 0.0  ;;  %3200 = vmatprep.subr.bf16.mxu1 %v3458_v0 }
 0x2a8   :  { %v1505_v49 = vpack.c.bf16 %v1504_v46, %v1504_v46 }
 0x2aa   :  { %1964 = vmatmul.mubr.bf16.vlgmr.msra.gmra.mrb[60].mxu0 %v1505_v49  ;;  %3197 = vmatmul.mubr.bf16.vlgmr.msra.gmra.mrb[60].mxu1 %v1505_v49 }
 0x2ab   :  { %2016 = vmatpush1.bf16.msra.mxu0 %v4208_v50  ;;  %3201 = vmatpush3.bf16.msra.mxu1 %v4275_v9 }
 0x2ac   :  { %2017 = vmatprep.subr.bf16.mxu0 %v4211_v43  ;;  %3202 = vmatprep.subr.bf16.mxu1 %v3458_v0 }
 0x2ad   :  { %2047 = vmatprep.mubr.bf16.mxu0 %v3460_v55  ;;  %3216 = vmatprep.mubr.msk.bf16.mxu1 %vm3459_vm0, %v3458_v0 }
 0x2af   :  { %2018 = vmatpush1.bf16.msra.mxu0 %v4214_v54  ;;  %3203 = vmatpush3.bf16.msra.mxu1 %v4278_v47 }
 0x2b0   :  { %2019 = vmatprep.subr.bf16.mxu0 %v4218_v52  ;;  %3204 = vmatprep.subr.bf16.mxu1 %v3458_v0 }
 0x2b3   :  { %2020 = vmatpush1.bf16.msra.mxu0 %v4225_v56  ;;  %3205 = vmatpush3.bf16.msra.mxu1 %v4284_v16 }
 0x2b4   :  { %2021 = vmatprep.subr.bf16.mxu0 %v4228_v57  ;;  %3206 = vmatprep.subr.bf16.mxu1 %v3458_v0 }
 0x2b7   :  { %2022 = vmatpush1.bf16.msra.mxu0 %v4233_v28  ;;  %3207 = vmatpush3.bf16.msra.mxu1 %v4288_v21 }
 0x2b8   :  { %2023 = vmatprep.subr.bf16.mxu0 %v4236_v58  ;;  %3208 = vmatprep.subr.bf16.mxu1 %v3458_v0 }
 0x2bb   :  { %2024 = vmatpush1.bf16.msra.mxu0 %v4241_v59  ;;  %3209 = vmatpush3.bf16.msra.mxu1 %v4292_v23 }
 0x2bc   :  { %2025 = vmatprep.subr.bf16.mxu0 %v4244_v26  ;;  %3210 = vmatprep.subr.bf16.mxu1 %v3458_v0 }
 0x2bf   :  { %v1540_v36 = vpop.f32.mrb[48].mxu0  ;;  %2026 = vmatpush1.bf16.msra.mxu0 %v4249_v60  ;;  %3211 = vmatpush3.bf16.msra.mxu1 %v4296_v24  ;;  %v1580_v51 = vpop.f32.mrb[48].mxu1 }
 0x2c0   :  { %v3078_v53 = vpop.f32.mrb[49].mxu0  ;;  %2027 = vmatprep.subr.bf16.mxu0 %v4252_v31  ;;  %3212 = vmatprep.subr.bf16.mxu1 %v3458_v0  ;;  %v1581_v62 = vadd.f32 %v1580_v51, %v1540_v36  ;;  %v3098_v63 = vpop.f32.mrb[49].mxu1 }
 0x2c1   :  { %v1543_v1 = vpop.f32.mrb[50].mxu0  ;;  %v1583_v2 = vpop.f32.mrb[50].mxu1 }
 0x2c2   :  { %v3079_v3 = vpop.f32.mrb[51].mxu0  ;;  %v3099_v35 = vpop.f32.mrb[51].mxu1 }
 0x2c3   :  { %2028 = vmatpush1.bf16.msra.mxu0 %v4257_v61  ;;  %3213 = vmatpush3.bf16.msra.mxu1 %v4300_v25 }
 0x2c4   :  { %2029 = vmatprep.subr.bf16.mxu0 %v4260_v33  ;;  %3214 = vmatprep.subr.bf16.mxu1 %v3458_v0 }
 0x2c7   :  { %2030 = vmatpush1.bf16.msra.mxu0 %v4265_v10  ;;  %3215 = vmatpush3.bf16.msra.mxu1 %v4309_v29 }
 0x2c8   :  { %2099 = vmatprep.subr.bf16.mxu0 %v4204_v34  ;;  %3220 = vmatprep.subr.bf16.mxu1 %v3458_v0 }
 0x2fb   :  { %v1620_v11 = vpop.f32.mrb[52].mxu0 }
 0x2fc   :  { %v1626_v12 = vadd.f32 %v1620_v11, %v1581_v62  ;;  %v3118_v4 = vpop.f32.mrb[53].mxu0 }
 0x2fd   :  { %v1623_v37 = vpop.f32.mrb[54].mxu0 }
 0x2fe   :  { %v1627_v5 = vadd.f32 %v4306_v41, %v1626_v12  ;;  %v3119_v13 = vpop.f32.mrb[55].mxu0 }
 0x300   :  { %v1628_v6 = vmax.f32 %v1627_v5, 0.0 }
 0x302   :  { %v1629_v14 = vpack.c.bf16 %v1628_v6, %v1628_v6 }
 0x304   :  { %2048 = vmatmul.mubr.bf16.vlgmr.msra.gmra.mrb[64].mxu0 %v1629_v14  ;;  %3217 = vmatmul.mubr.bf16.vlgmr.msra.gmra.mrb[64].mxu1 %v1629_v14 }
 0x305   :  { %2100 = vmatpush1.bf16.msra.mxu0 %v4208_v50  ;;  %3221 = vmatpush3.bf16.msra.mxu1 %v4275_v9 }
 0x306   :  { %2101 = vmatprep.subr.bf16.mxu0 %v4211_v43  ;;  %3222 = vmatprep.subr.bf16.mxu1 %v3458_v0 }
 0x307   :  { %2131 = vmatprep.mubr.bf16.mxu0 %v3460_v55  ;;  %3236 = vmatprep.mubr.msk.bf16.mxu1 %vm3459_vm0, %v3458_v0 }
 0x309   :  { %2102 = vmatpush1.bf16.msra.mxu0 %v4214_v54  ;;  %3223 = vmatpush3.bf16.msra.mxu1 %v4278_v47  ;;  %v1789_v47 = vshrl.u32 %v1788_v20, 7 }
 0x30a   :  { %2103 = vmatprep.subr.bf16.mxu0 %v4218_v52  ;;  %3224 = vmatprep.subr.bf16.mxu1 %v3458_v0 }
 0x30d   :  { %2104 = vmatpush1.bf16.msra.mxu0 %v4225_v56  ;;  %3225 = vmatpush3.bf16.msra.mxu1 %v4284_v16  ;;  %v1790_v16 = vsub.s32 0, %v1789_v47 }
 0x30e   :  { %2105 = vmatprep.subr.bf16.mxu0 %v4228_v57  ;;  %3226 = vmatprep.subr.bf16.mxu1 %v3458_v0 }
 0x311   :  { %2106 = vmatpush1.bf16.msra.mxu0 %v4233_v28  ;;  %3227 = vmatpush3.bf16.msra.mxu1 %v4288_v21  ;;  %v1798_v21 = vsub.s32 2, %v1789_v47 }
 0x312   :  { %2107 = vmatprep.subr.bf16.mxu0 %v4236_v58  ;;  %3228 = vmatprep.subr.bf16.mxu1 %v3458_v0 }
 0x315   :  { %2108 = vmatpush1.bf16.msra.mxu0 %v4241_v59  ;;  %3229 = vmatpush3.bf16.msra.mxu1 %v4292_v23  ;;  %v1786_v23 = vld [vmem:[%s4406_s6] sm:$0x7]  ;;  %s3461_s6 = smov [#allocation10]  }
 0x316   :  { %2109 = vmatprep.subr.bf16.mxu0 %v4244_v26  ;;  %3230 = vmatprep.subr.bf16.mxu1 %v3458_v0  ;;  %v1799_v38 = vrot.slane %v1786_v23, %v1798_v21  ;;  %s2198_s30 = sshll.u32 %s3461_s6, 4  ;;  %s2199_s30 = int_to_ptr.vmem [resolvable:$true] %s2198_s30 }
 0x317   :  { %s3420_s8 = scalar_lea.vmem %s2199_s30, 128  ;;  %p3425_p5 = scmp.lt.s32.totalorder %s2199_s30, %s2199_s30 }
 0x318   :  { %p3421_p4 = scmp.ne.s32.totalorder %s2199_s30, %s3420_s8  ;;  %p3426_p6 = scmp.lt.s32.totalorder %s3420_s8, %s3420_s8 }
 0x319   :  { %2110 = vmatpush1.bf16.msra.mxu0 %v4249_v60  ;;  %3231 = vmatpush3.bf16.msra.mxu1 %v4296_v24  ;;  %v1794_v24 = vsub.s32 1, %v1789_v47 }
 0x31a   :  { %2111 = vmatprep.subr.bf16.mxu0 %v4252_v31  ;;  %3232 = vmatprep.subr.bf16.mxu1 %v3458_v0  ;;  %p3427_p7 = por %p3426_p6, %p3425_p5 }
 0x31b   :  { %v1704_v34 = vpop.f32.mrb[56].mxu0  ;;  %v1795_v18 = vrot.slane %v1786_v23, %v1794_v24 }
 0x31c   :  { %v3158_v50 = vpop.f32.mrb[57].mxu0  ;;  %p3428_p8 = pnand %p3427_p7, %p3421_p4 }
 0x31d   :  { %v1707_v43 = vpop.f32.mrb[58].mxu0  ;;  %v1664_v54 = vpop.f32.mrb[52].mxu1  ;;  %2112 = vmatpush1.bf16.msra.mxu0 %v4257_v61  ;;  %3233 = vmatpush3.bf16.msra.mxu1 %v4300_v25  ;;  %v1791_v25 = vrot.slane %v1786_v23, %v1790_v16 }
 0x31e   :  { %v1705_v55 = vadd.f32 %v1704_v34, %v1664_v54  ;;  %v3159_v52 = vpop.f32.mrb[59].mxu0  ;;  %v3138_v56 = vpop.f32.mrb[53].mxu1  ;;  %2113 = vmatprep.subr.bf16.mxu0 %v4260_v33  ;;  %3234 = vmatprep.subr.bf16.mxu1 %v3458_v0 }
 0x31f   :  { %v1667_v57 = vpop.f32.mrb[54].mxu1 }
 0x320   :  { %v3139_v28 = vpop.f32.mrb[55].mxu1 }
 0x321   :  { %2114 = vmatpush1.bf16.msra.mxu0 %v4265_v10  ;;  %3235 = vmatpush3.bf16.msra.mxu1 %v4309_v29 }
 0x35b   :  { %v1744_v58 = vpop.f32.mrb[56].mxu1 }
 0x35c   :  { %v1750_v59 = vadd.f32 %v1744_v58, %v1705_v55  ;;  %v3178_v26 = vpop.f32.mrb[57].mxu1 }
 0x35d   :  { %v1747_v60 = vpop.f32.mrb[58].mxu1 }
 0x35e   :  { %v1751_v31 = vadd.f32 %v4306_v41, %v1750_v59  ;;  %v3179_v61 = vpop.f32.mrb[59].mxu1 }
 0x360   :  { %v1752_v15 = vmax.f32 %v1751_v31, 0.0 }
 0x362   :  { %v1753_v17 = vpack.c.bf16 %v1752_v15, %v1752_v15 }
 0x364   :  { %2132 = vmatmul.mubr.bf16.vlgmr.msra.gmra.mrb[68].mxu0 %v1753_v17  ;;  %3237 = vmatmul.mubr.bf16.vlgmr.msra.gmra.mrb[68].mxu1 %v1753_v17 }
 0x37d   :  { %v1965_v33 = vpop.f32.mrb[60].mxu0  ;;  %v2006_v7 = vpop.f32.mrb[60].mxu1 }
 0x37e   :  { %v1967_v0 = vpop.f32.mrb[61].mxu0  ;;  %v3198_v48 = vpop.f32.mrb[61].mxu1  ;;  %v1966_v39 = vadd.f32 %v1965_v33, %v1791_v25  ;;  %v2007_v40 = vadd.f32 %v2006_v7, %v1799_v38 }
 0x37f   :  { %v1969_v19 = vpop.f32.mrb[62].mxu0  ;;  %v2009_v8 = vpop.f32.mrb[62].mxu1  ;;  %v1968_v41 = vadd.f32 %v1967_v0, %v1795_v18 }
 0x380   :  { %v1970_v10 = vpop.f32.mrb[63].mxu0  ;;  %v3199_v9 = vpop.f32.mrb[63].mxu1  ;;  %v2012_v49 = vmax.f32 %v1966_v39, 0.0  ;;  %v2014_v36 = vmax.f32 %v2007_v40, 0.0 }
 0x381   :  { %v2013_v1 = vmax.f32 %v1968_v41, 0.0 }
 0x3d7   :  { %v2049_v22 = vpop.f32.mrb[64].mxu0  ;;  %v2090_v27 = vpop.f32.mrb[64].mxu1 }
 0x3d8   :  { %v2050_v29 = vadd.f32 %v2049_v22, %v1791_v25  ;;  %v2091_v42 = vadd.f32 %v2090_v27, %v1799_v38  ;;  %v2051_v30 = vpop.f32.mrb[65].mxu0  ;;  %v3218_v44 = vpop.f32.mrb[65].mxu1 }
 0x3d9   :  { %v2052_v45 = vadd.f32 %v2051_v30, %v1795_v18  ;;  %v2053_v32 = vpop.f32.mrb[66].mxu0  ;;  %v2093_v46 = vpop.f32.mrb[66].mxu1 }
 0x3da   :  { %v2096_v51 = vmax.f32 %v2050_v29, 0.0  ;;  %v2098_v53 = vmax.f32 %v2091_v42, 0.0  ;;  %v2054_v62 = vpop.f32.mrb[67].mxu0  ;;  %v3219_v63 = vpop.f32.mrb[67].mxu1 }
 0x3db   :  { %v2097_v2 = vmax.f32 %v2052_v45, 0.0 }
 0x3dc   :  { %v2183_v3 = vmax.f32 %v2012_v49, %v2096_v51  ;;  %v2185_v35 = vmax.f32 %v2014_v36, %v2098_v53 }
 0x3dd   :  { %v2184_v11 = vmax.f32 %v2013_v1, %v2097_v2 }
 0x437   :  { %v2133_v12 = vpop.f32.mrb[68].mxu0  ;;  %v2174_v4 = vpop.f32.mrb[68].mxu1 }
 0x438   :  { %v2134_v37 = vadd.f32 %v2133_v12, %v1791_v25  ;;  %v2175_v5 = vadd.f32 %v2174_v4, %v1799_v38  ;;  %v2135_v13 = vpop.f32.mrb[69].mxu0  ;;  %v3238_v6 = vpop.f32.mrb[69].mxu1 }
 0x439   :  { %v2136_v14 = vadd.f32 %v2135_v13, %v1795_v18  ;;  %v2137_v34 = vpop.f32.mrb[70].mxu0  ;;  %v2177_v50 = vpop.f32.mrb[70].mxu1 }
 0x43a   :  { %v2180_v43 = vmax.f32 %v2134_v37, 0.0  ;;  %v2182_v54 = vmax.f32 %v2175_v5, 0.0  ;;  %v2138_v55 = vpop.f32.mrb[71].mxu0  ;;  %v3239_v52 = vpop.f32.mrb[71].mxu1 }
 0x43b   :  { %v2181_v56 = vmax.f32 %v2136_v14, 0.0 }
 0x43c   :  { %v2186_v57 = vmax.f32 %v2183_v3, %v2180_v43  ;;  %v2188_v28 = vmax.f32 %v2185_v35, %v2182_v54 }
 0x43d   :  { %v2187_v58 = vmax.f32 %v2184_v11, %v2181_v56 }
 0x43f   :  { %v2189_v59 = vmax.f32 %v2186_v57, %v2187_v58 }
 0x441   :  { %v2190_v26 = vmax.f32 %v2189_v59, %v2188_v28 }
 0x443   :  { %2191 = vst [vmem:[#allocation10] sm:$0xff] %v2190_v26 }
 0x444   :  { %3431 = shalt.err (!%p3428_p8)
}
 0x445   :  { %s3432_s11 = scalar_lea.hbm %s4407_s7, 128 }
 0x446   :  { %p3433_p9 = scmp.ne.s32.totalorder %s4407_s7, %s3432_s11  ;;  %p3436_p10 = scmp.lt.u32.totalorder %s3432_s11, %s4407_s7 }
 0x448   :  { %p3438_p11 = pnand %p3436_p10, %p3433_p9 }
 0x44a   :  { %3441 = shalt.err (!%p3438_p11)
}
 0x44b   :  { %2201 = dma.vmem_to_hbm [thread:$0]  %s2199_s30, 128, %s4407_s7, [#allocation4]  }
 0x44c   :  { %3448 = dma.done.wait [#allocation4], 128  }
 0x44d   :  { %3449 = vsyncadd [#allocation4], 4294967168 }
 0x44e   :  { %2205 = vsyncpa [#allocation3], 1 }
 0x44f   :  { %2206 = vsyncpa [#allocation6], 1 }
 0x450   :  { %2207 = vsyncpa [#allocation9], 1 }
 0x451   :  { %2208 = vsyncpa [#allocation4], 1 }

</bundles_post_ra>
